<compile_context>
chip_gen: v6e
topology: v6e:2x2x1
jax: 0.10.0
libtpu: 0.0.40
codegen_flags: <defaults>
</compile_context>

<pallas_src>
import functools

import jax
import jax.numpy as jnp
from jax.experimental import pallas as pl
from jax.experimental.pallas import tpu as pltpu

LN_EPS = 1e-5  # PyTorch nn.LayerNorm default


# ------------------------------ tile helpers --------------------------------

def _cdiv(a, b):
    return -(-a // b)


def _row_tile(m, cap=512):
    """Balanced row tile: ~cap rows, multiple of 16 (bf16 sublane packing).

    Uses a cdiv grid; the tail block is padded (garbage rows dropped on write).
    If m fits in one block the full dim is used (always a legal block shape).
    """
    nblocks = _cdiv(m, cap)
    t = _cdiv(m, nblocks)
    t = _cdiv(t, 16) * 16
    return min(t, m) if nblocks == 1 else t


def _lane_tile(n, cap=512):
    """Lane (output-column) tile: a divisor of n that is a multiple of 128,
    else the full dim.  Never forces lane padding for standard ViT dims."""
    if n % 128 != 0:
        return n
    for c in (512, 384, 256, 128):
        if c <= cap and n % c == 0:
            return c
    return min(cap, n)


def _k_tile(k, cap=512):
    """Contraction tile: must divide k exactly (K padding would be incorrect)."""
    if k % 128 != 0:
        return k
    for c in (512, 384, 256, 128):
        if c <= cap and k % c == 0:
            return c
    return k


def _heads_per_block(heads, dim_head):
    """Heads processed per attention grid step.

    Prefer 2 heads (128-lane blocks for dim_head=64, batched MXU pushes); fall
    back to all heads in one step if the lane widths would violate the
    (8, 128) block rule.
    """
    for hpb in (2, 1):
        if heads % hpb == 0:
            width = hpb * dim_head
            if heads // hpb == 1 or width % 128 == 0:
                return hpb
    return heads


# ----------------------------- Pallas kernels -------------------------------

def _layernorm_kernel(x_ref, g_ref, b_ref, o_ref):
    x = x_ref[...].astype(jnp.float32)
    mu = jnp.mean(x, axis=-1, keepdims=True)
    var = jnp.mean(jnp.square(x - mu), axis=-1, keepdims=True)
    y = (x - mu) * jax.lax.rsqrt(var + LN_EPS)
    y = y * g_ref[...].astype(jnp.float32) + b_ref[...].astype(jnp.float32)
    o_ref[...] = y.astype(o_ref.dtype)


def _posadd_kernel(x_ref, pos_ref, o_ref):
    # x block: (1, N, D); pos block: (N, D) (batch-invariant, no B-fold copy).
    y = x_ref[...].astype(jnp.float32) + pos_ref[...].astype(jnp.float32)
    o_ref[...] = y.astype(o_ref.dtype)


def _make_linear_kernel(has_ln, has_bias, has_residual, activation):
    """Tiled matmul with fused LN prologue (cached) and bias/GELU/residual epilogue.

    Ref order: x, w, [ln_g, ln_b], [bias], [residual], out, acc, [ln_cache].
    When has_ln is True the wrapper guarantees the K axis is NOT tiled and the
    LN(x) (bf16) result is cached across the output-column (j) grid steps.
    """

    def kernel(*refs):
        it = iter(refs)
        x_ref = next(it)
        w_ref = next(it)
        g_ref = next(it) if has_ln else None
        bln_ref = next(it) if has_ln else None
        b_ref = next(it) if has_bias else None
        r_ref = next(it) if has_residual else None
        o_ref = next(it)
        acc_ref = next(it)
        xln_ref = next(it) if has_ln else None

        j = pl.program_id(1)
        k_id = pl.program_id(2)

        @pl.when(k_id == 0)
        def _init():
            acc_ref[...] = jnp.zeros_like(acc_ref)

        if has_ln:
            # K untiled here; compute LN(x) once per row tile and reuse for all j.
            @pl.when(j == 0)
            def _ln():
                x = x_ref[...].astype(jnp.float32)
                mu = jnp.mean(x, axis=-1, keepdims=True)
                var = jnp.mean(jnp.square(x - mu), axis=-1, keepdims=True)
                xn = (x - mu) * jax.lax.rsqrt(var + LN_EPS)
                xn = (xn * g_ref[...].astype(jnp.float32)
                      + bln_ref[...].astype(jnp.float32))
                xln_ref[...] = xn.astype(xln_ref.dtype)

            x_mxu = xln_ref[...]                       # bf16
        else:
            x_mxu = x_ref[...].astype(jnp.bfloat16)    # no-op when already bf16

        # bf16 MXU operands (weights pre-cast to bf16), f32 accumulation.
        acc_ref[...] += jnp.dot(x_mxu, w_ref[...],
                                preferred_element_type=jnp.float32)

        @pl.when(k_id == pl.num_programs(2) - 1)
        def _finish():
            y = acc_ref[...]
            if has_bias:
                y = y + b_ref[...].astype(jnp.float32)
            if activation == "gelu":
                # TODO(synk): exact-erf GELU; tanh approximation used here.
                c = 0.7978845608028654  # sqrt(2/pi)
                y = 0.5 * y * (1.0 + jnp.tanh(c * (y + 0.044715 * (y * y * y))))
            if has_residual:
                y = y + r_ref[...].astype(jnp.float32)
            o_ref[...] = y.astype(o_ref.dtype)

    return kernel


def _attn_kernel(qkv_ref, o_ref, *, hpb, dim_head):
    """One (batch, head-group) per grid step.

    qkv block: (1, N, 3*width) holding this group's [q | k | v] (weight columns
    were permuted at parameter-prep time; attention scale folded into q).
    out block: (1, N, width) — single lane-dense store.
    """
    dh = dim_head
    width = hpb * dh
    N = qkv_ref.shape[1]
    blk = qkv_ref[0]                                   # (N, 3*width) bf16
    q = blk[:, 0 * width:1 * width].reshape(N, hpb, dh)
    k = blk[:, 1 * width:2 * width].reshape(N, hpb, dh)
    v = blk[:, 2 * width:3 * width].reshape(N, hpb, dh)

    # Batched-heads score matmul (scale already folded into q's weight columns).
    s = jnp.einsum('qhd,khd->hqk', q, k,
                   preferred_element_type=jnp.float32)          # (hpb, N, N)
    s = s - jnp.max(s, axis=-1, keepdims=True)
    p = jnp.exp(s)
    denom = jnp.sum(p, axis=-1, keepdims=True)                  # (hpb, N, 1)
    o = jnp.einsum('hqk,khd->hqd', p.astype(jnp.bfloat16), v,
                   preferred_element_type=jnp.float32)          # (hpb, N, dh)
    o = o * pl.reciprocal(denom, approx=True)

    parts = [o[a].astype(o_ref.dtype) for a in range(hpb)]
    o_ref[0] = parts[0] if hpb == 1 else jnp.concatenate(parts, axis=-1)


# ----------------------------- Pallas wrappers -------------------------------

def layernorm(x2d, gamma, beta, out_dtype=None):
    M, D = x2d.shape
    out_dtype = out_dtype or x2d.dtype
    tm = _row_tile(M)
    return pl.pallas_call(
        _layernorm_kernel,
        out_shape=jax.ShapeDtypeStruct((M, D), out_dtype),
        grid=(pl.cdiv(M, tm),),
        in_specs=[pl.BlockSpec((tm, D), lambda i: (i, 0)),
                  pl.BlockSpec((1, D), lambda i: (0, 0)),
                  pl.BlockSpec((1, D), lambda i: (0, 0))],
        out_specs=pl.BlockSpec((tm, D), lambda i: (i, 0)),
        compiler_params=pltpu.CompilerParams(dimension_semantics=("parallel",)),
    )(x2d, gamma.reshape(1, D), beta.reshape(1, D))


def add_pos(x3d, pos2d):
    """x3d: (B, N, D); pos2d: (N, D) — pos is read once per batch block, not
    materialized B times in HBM."""
    B, N, D = x3d.shape
    return pl.pallas_call(
        _posadd_kernel,
        out_shape=jax.ShapeDtypeStruct((B, N, D), x3d.dtype),
        grid=(B,),
        in_specs=[pl.BlockSpec((1, N, D), lambda b: (b, 0, 0)),
                  pl.BlockSpec((N, D), lambda b: (0, 0))],
        out_specs=pl.BlockSpec((1, N, D), lambda b: (b, 0, 0)),
        compiler_params=pltpu.CompilerParams(dimension_semantics=("parallel",)),
    )(x3d, pos2d)


def linear_fused(x2d, w, bias=None, residual=None, activation=None, ln=None,
                 out_dtype=jnp.bfloat16):
    """y = epilogue( LN?(x) @ w ) with optional bias / GELU / residual epilogue.

    w: (K, N) bf16 (PyTorch Linear.weight transposed).  ln: (gamma, beta) over K.
    """
    M, K = x2d.shape
    K2, N = w.shape
    assert K == K2
    has_ln = ln is not None
    has_bias = bias is not None
    has_residual = residual is not None

    tm = _row_tile(M)
    tn = _lane_tile(N)
    tk = K if has_ln else _k_tile(K)        # LN prologue needs full feature rows.
    grid = (pl.cdiv(M, tm), pl.cdiv(N, tn), pl.cdiv(K, tk))

    inputs = [x2d, w]
    in_specs = [
        pl.BlockSpec((tm, tk), lambda i, j, k: (i, k)),
        pl.BlockSpec((tk, tn), lambda i, j, k: (k, j)),
    ]
    if has_ln:
        g, b_ln = ln
        inputs += [g.reshape(1, K), b_ln.reshape(1, K)]
        in_specs += [pl.BlockSpec((1, tk), lambda i, j, k: (0, k)),
                     pl.BlockSpec((1, tk), lambda i, j, k: (0, k))]
    if has_bias:
        inputs.append(bias.reshape(1, N))
        in_specs.append(pl.BlockSpec((1, tn), lambda i, j, k: (0, j)))
    if has_residual:
        inputs.append(residual)
        in_specs.append(pl.BlockSpec((tm, tn), lambda i, j, k: (i, j)))

    scratch = [pltpu.VMEM((tm, tn), jnp.float32)]
    if has_ln:
        scratch.append(pltpu.VMEM((tm, tk), jnp.bfloat16))   # cached LN(x)

    # With the LN cache the j axis must not be megacore-split (cache filled at j==0).
    dims = (("parallel", "arbitrary", "arbitrary") if has_ln
            else ("parallel", "parallel", "arbitrary"))

    kernel = _make_linear_kernel(has_ln, has_bias, has_residual, activation)
    return pl.pallas_call(
        kernel,
        out_shape=jax.ShapeDtypeStruct((M, N), out_dtype),
        grid=grid,
        in_specs=in_specs,
        out_specs=pl.BlockSpec((tm, tn), lambda i, j, k: (i, j)),
        scratch_shapes=scratch,
        compiler_params=pltpu.CompilerParams(dimension_semantics=dims),
    )(*inputs)


def attention_core(qkv, heads, dim_head, hpb):
    """qkv: (B, N, 3*heads*dim_head) in grouped layout -> (B, N, heads*dim_head)."""
    B, N, three_inner = qkv.shape
    inner = heads * dim_head
    assert three_inner == 3 * inner
    ng = heads // hpb
    width = hpb * dim_head
    kernel = functools.partial(_attn_kernel, hpb=hpb, dim_head=dim_head)
    return pl.pallas_call(
        kernel,
        out_shape=jax.ShapeDtypeStruct((B, N, inner), qkv.dtype),
        grid=(B, ng),
        in_specs=[pl.BlockSpec((1, N, 3 * width), lambda b, g: (b, 0, g))],
        out_specs=pl.BlockSpec((1, N, width), lambda b, g: (b, 0, g)),
        compiler_params=pltpu.CompilerParams(
            dimension_semantics=("parallel", "parallel")),
    )(qkv)


# ------------------------------ parameters ----------------------------------

def _prep_qkv_weight(wqkv, heads, dim_head, hpb, scale):
    """From PyTorch layout (dim, [q|k|v] head-major) to per-head-group
    [g0: q|k|v][g1: q|k|v]... layout; folds the attention scale into q; bf16."""
    dim = wqkv.shape[0]
    inner = heads * dim_head
    ng = heads // hpb
    width = hpb * dim_head
    wq = wqkv[:, :inner] * scale
    wk = wqkv[:, inner:2 * inner]
    wv = wqkv[:, 2 * inner:3 * inner]
    stacked = jnp.stack([wq.reshape(dim, ng, width),
                         wk.reshape(dim, ng, width),
                         wv.reshape(dim, ng, width)], axis=2)   # (dim, ng, 3, width)
    return stacked.reshape(dim, 3 * inner).astype(jnp.bfloat16)


def init_vit_params(key, *, in_channels, patch_size, image_size, dim, depth,
                    heads, dim_head, mlp_dim):
    num_patches = (image_size // patch_size) ** 2
    patch_dim = in_channels * patch_size * patch_size
    inner = heads * dim_head
    scale = dim_head ** -0.5
    hpb = _heads_per_block(heads, dim_head)
    keys = iter(jax.random.split(key, 8 + 8 * depth))

    def nrm(shape, s=0.02):
        return (s * jax.random.normal(next(keys), shape)).astype(jnp.float32)

    params = {
        "patch_ln1_g": jnp.ones((patch_dim,), jnp.float32),
        "patch_ln1_b": jnp.zeros((patch_dim,), jnp.float32),
        "patch_w": nrm((patch_dim, dim)).astype(jnp.bfloat16),
        "patch_b": jnp.zeros((dim,), jnp.float32),
        "patch_ln2_g": jnp.ones((dim,), jnp.float32),
        "patch_ln2_b": jnp.zeros((dim,), jnp.float32),
        "pos_emb": nrm((1, num_patches + 1, dim), 1.0),   # torch.randn
        "cls": nrm((1, 1, dim), 1.0),                     # torch.randn
        "final_ln_g": jnp.ones((dim,), jnp.float32),
        "final_ln_b": jnp.zeros((dim,), jnp.float32),
        "layers": [],
    }
    for _ in range(depth):
        wqkv = nrm((dim, 3 * inner))                      # to_qkv (no bias)
        params["layers"].append({
            "attn_ln_g": jnp.ones((dim,), jnp.float32),
            "attn_ln_b": jnp.zeros((dim,), jnp.float32),
            "wqkv": _prep_qkv_weight(wqkv, heads, dim_head, hpb, scale),
            "wo": nrm((inner, dim)).astype(jnp.bfloat16),  # to_out
            "bo": jnp.zeros((dim,), jnp.float32),
            "ff_ln_g": jnp.ones((dim,), jnp.float32),
            "ff_ln_b": jnp.zeros((dim,), jnp.float32),
            "w1": nrm((dim, mlp_dim)).astype(jnp.bfloat16),
            "b1": jnp.zeros((mlp_dim,), jnp.float32),
            "w2": nrm((mlp_dim, dim)).astype(jnp.bfloat16),
            "b2": jnp.zeros((dim,), jnp.float32),
        })
    return params


# ------------------------------ forward pass ---------------------------------

def vit_forward(params, img, *, patch_size, heads, dim_head):
    B, C, H, W = img.shape
    p = patch_size
    h, w = H // p, W // p
    n = h * w
    patch_dim = p * p * C
    dim = params["patch_w"].shape[1]
    inner = heads * dim_head
    hpb = _heads_per_block(heads, dim_head)

    # --- to_patch_embedding ---
    # Rearrange 'b c (h p1) (w p2) -> b (h w) (p1 p2 c)' (plain JAX glue).
    x = img.reshape(B, C, h, p, w, p)
    x = jnp.transpose(x, (0, 2, 4, 3, 5, 1)).reshape(B * n, patch_dim)

    # LN(patch_dim) fused as prologue into the patch-embedding matmul, then LN(dim).
    x = linear_fused(x, params["patch_w"], bias=params["patch_b"],
                     ln=(params["patch_ln1_g"], params["patch_ln1_b"]))
    x = layernorm(x, params["patch_ln2_g"], params["patch_ln2_b"])
    x = x.reshape(B, n, dim)

    # --- cls token + positional embedding ---
    cls = jnp.broadcast_to(params["cls"], (B, 1, dim)).astype(x.dtype)
    x = jnp.concatenate([cls, x], axis=1)                 # (B, n+1, dim)
    N = n + 1
    x = add_pos(x, params["pos_emb"][0, :N])              # batch-invariant pos input
    x = x.reshape(B * N, dim)
    # emb_dropout = 0 and dropout = 0 -> identity

    # --- transformer ---
    for layer in params["layers"]:
        # attention block: x = attn(x) + x
        x_res = x
        qkv = linear_fused(x, layer["wqkv"],
                           ln=(layer["attn_ln_g"], layer["attn_ln_b"]))
        attn = attention_core(qkv.reshape(B, N, 3 * inner), heads, dim_head, hpb)
        x = linear_fused(attn.reshape(B * N, inner), layer["wo"],
                         bias=layer["bo"], residual=x_res)

        # feedforward block: x = ff(x) + x
        x_res = x
        h1 = linear_fused(x, layer["w1"], bias=layer["b1"], activation="gelu",
                          ln=(layer["ff_ln_g"], layer["ff_ln_b"]))
        x = linear_fused(h1, layer["w2"], bias=layer["b2"], residual=x_res)

    # final norm (f32 output to match the PyTorch reference dtype)
    x = layernorm(x, params["final_ln_g"], params["final_ln_b"],
                  out_dtype=jnp.float32)
    return x.reshape(B, N, dim)


# --------------------------------- main ---------------------------------------

if __name__ == "__main__":
    # small, self-consistent config
    B, C, IMG, P = 2, 4, 16, 8           # -> 4 patches, patch_dim = 256
    DIM, DEPTH, HEADS, DIM_HEAD, MLP = 32, 2, 2, 16, 64

    key = jax.random.PRNGKey(0)
    kp, kx = jax.random.split(key)
    params = init_vit_params(kp, in_channels=C, patch_size=P, image_size=IMG,
                             dim=DIM, depth=DEPTH, heads=HEADS,
                             dim_head=DIM_HEAD, mlp_dim=MLP)
    img = jax.random.normal(kx, (B, C, IMG, IMG), dtype=jnp.float32)

    fwd = jax.jit(functools.partial(vit_forward, patch_size=P,
                                    heads=HEADS, dim_head=DIM_HEAD))
    out = fwd(params, img)
    out = jax.block_until_ready(out)

    expected_tokens = (IMG // P) ** 2 + 1
    assert out.shape == (B, expected_tokens, DIM), out.shape
    assert jnp.all(jnp.isfinite(out))
    print("KERNEL_OK")
</pallas_src>

<mosaic_0001>
module attributes {stable_mosaic.version = 11 : i64} {
  func.func @_layernorm_kernel(%arg0: i32, %arg1: memref<8x32xbf16, #tpu.memory_space<vmem>>, %arg2: memref<1x32xf32, #tpu.memory_space<vmem>>, %arg3: memref<1x32xf32, #tpu.memory_space<vmem>>, %arg4: memref<8x32xbf16, #tpu.memory_space<vmem>>) attributes {dimension_semantics = [#tpu.dimension_semantics<parallel>], iteration_bounds = array<i64: 1>, scalar_prefetch = 0 : i64, scratch_operands = 0 : i64, tpu.core_type = #tpu.core_type<tc>, window_params = [{transform_indices = @transform_0, window_bounds = array<i64: 8, 32>}, {pipeline_mode = #tpu.pipeline_mode<synchronous>, transform_indices = @transform_1, window_bounds = array<i64: 1, 32>}, {pipeline_mode = #tpu.pipeline_mode<synchronous>, transform_indices = @transform_2, window_bounds = array<i64: 1, 32>}, {transform_indices = @transform_3, window_bounds = array<i64: 8, 32>}]} {
    %c0 = arith.constant 0 : index
    %c0_0 = arith.constant 0 : index
    %0 = vector.load %arg1[%c0, %c0_0] : memref<8x32xbf16, #tpu.memory_space<vmem>>, vector<8x32xbf16>
    %1 = arith.extf %0 : vector<8x32xbf16> to vector<8x32xf32>
    %cst = arith.constant dense<0.000000e+00> : vector<8xf32>
    %2 = vector.multi_reduction <add>, %1, %cst [1] : vector<8x32xf32> to vector<8xf32>
    %3 = vector.shape_cast %2 : vector<8xf32> to vector<8x1xf32>
    %cst_1 = arith.constant 3.200000e+01 : f32
    %4 = vector.broadcast %cst_1 : f32 to vector<8x1xf32>
    %5 = arith.divf %3, %4 : vector<8x1xf32>
    %6 = vector.broadcast %5 : vector<8x1xf32> to vector<8x32xf32>
    %7 = arith.subf %1, %6 : vector<8x32xf32>
    %8 = arith.mulf %7, %7 : vector<8x32xf32>
    %cst_2 = arith.constant dense<0.000000e+00> : vector<8xf32>
    %9 = vector.multi_reduction <add>, %8, %cst_2 [1] : vector<8x32xf32> to vector<8xf32>
    %10 = vector.shape_cast %9 : vector<8xf32> to vector<8x1xf32>
    %cst_3 = arith.constant 3.200000e+01 : f32
    %11 = vector.broadcast %cst_3 : f32 to vector<8x1xf32>
    %12 = arith.divf %10, %11 : vector<8x1xf32>
    %13 = vector.broadcast %5 : vector<8x1xf32> to vector<8x32xf32>
    %14 = arith.subf %1, %13 : vector<8x32xf32>
    %cst_4 = arith.constant 9.99999974E-6 : f32
    %15 = vector.broadcast %cst_4 : f32 to vector<8x1xf32>
    %16 = arith.addf %12, %15 : vector<8x1xf32>
    %17 = math.rsqrt %16 : vector<8x1xf32>
    %18 = vector.broadcast %17 : vector<8x1xf32> to vector<8x32xf32>
    %19 = arith.mulf %14, %18 : vector<8x32xf32>
    %c0_5 = arith.constant 0 : index
    %c0_6 = arith.constant 0 : index
    %20 = vector.load %arg2[%c0_5, %c0_6] : memref<1x32xf32, #tpu.memory_space<vmem>>, vector<1x32xf32>
    %21 = vector.broadcast %20 : vector<1x32xf32> to vector<8x32xf32>
    %22 = arith.mulf %19, %21 : vector<8x32xf32>
    %c0_7 = arith.constant 0 : index
    %c0_8 = arith.constant 0 : index
    %23 = vector.load %arg3[%c0_7, %c0_8] : memref<1x32xf32, #tpu.memory_space<vmem>>, vector<1x32xf32>
    %24 = vector.broadcast %23 : vector<1x32xf32> to vector<8x32xf32>
    %25 = arith.addf %22, %24 : vector<8x32xf32>
    %26 = arith.truncf %25 : vector<8x32xf32> to vector<8x32xbf16>
    %c0_9 = arith.constant 0 : index
    %c0_10 = arith.constant 0 : index
    %27 = vector.load %arg4[%c0_9, %c0_10] : memref<8x32xbf16, #tpu.memory_space<vmem>>, vector<8x32xbf16>
    tpu.vector_store %arg4[%c0_9, %c0_10], %26 {strides = array<i32>} : memref<8x32xbf16, #tpu.memory_space<vmem>>, vector<8x32xbf16>,
    return
  }
  func.func @transform_0(%arg0: i32) -> (i32, i32) {
    %c0_i32 = arith.constant 0 : i32
    %c0_i32_0 = arith.constant 0 : i32
    return %arg0, %c0_i32 : i32, i32
  }
  func.func @transform_1(%arg0: i32) -> (i32, i32) {
    %c0_i32 = arith.constant 0 : i32
    %c0_i32_0 = arith.constant 0 : i32
    %c0_i32_1 = arith.constant 0 : i32
    return %c0_i32, %c0_i32_0 : i32, i32
  }
  func.func @transform_2(%arg0: i32) -> (i32, i32) {
    %c0_i32 = arith.constant 0 : i32
    %c0_i32_0 = arith.constant 0 : i32
    %c0_i32_1 = arith.constant 0 : i32
    return %c0_i32, %c0_i32_0 : i32, i32
  }
  func.func @transform_3(%arg0: i32) -> (i32, i32) {
    %c0_i32 = arith.constant 0 : i32
    %c0_i32_0 = arith.constant 0 : i32
    return %arg0, %c0_i32 : i32, i32
  }
}

module attributes {stable_mosaic.version = 11 : i64} {
  func.func @kernel(%arg0: i32, %arg1: i32, %arg2: i32, %arg3: memref<8x256xf32, #tpu.memory_space<vmem>>, %arg4: memref<256x32xbf16, #tpu.memory_space<vmem>>, %arg5: memref<1x256xf32, #tpu.memory_space<vmem>>, %arg6: memref<1x256xf32, #tpu.memory_space<vmem>>, %arg7: memref<1x32xf32, #tpu.memory_space<vmem>>, %arg8: memref<8x32xbf16, #tpu.memory_space<vmem>>, %arg9: memref<8x32xf32, #tpu.memory_space<vmem>>, %arg10: memref<8x256xbf16, #tpu.memory_space<vmem>>) attributes {dimension_semantics = [#tpu.dimension_semantics<parallel>, #tpu.dimension_semantics<arbitrary>, #tpu.dimension_semantics<arbitrary>], iteration_bounds = array<i64: 1, 1, 1>, scalar_prefetch = 0 : i64, scratch_operands = 2 : i64, tpu.core_type = #tpu.core_type<tc>, window_params = [{transform_indices = @transform_0, window_bounds = array<i64: 8, 256>}, {transform_indices = @transform_1, window_bounds = array<i64: 256, 32>}, {transform_indices = @transform_2, window_bounds = array<i64: 1, 256>}, {transform_indices = @transform_3, window_bounds = array<i64: 1, 256>}, {transform_indices = @transform_4, window_bounds = array<i64: 1, 32>}, {transform_indices = @transform_5, window_bounds = array<i64: 8, 32>}]} {
    %c0_i32 = arith.constant 0 : i32
    %0 = arith.cmpi eq, %arg2, %c0_i32 : i32
    %1 = arith.extui %0 : i1 to i32
    %c0_i32_0 = arith.constant 0 : i32
    %2 = arith.cmpi ne, %1, %c0_i32_0 : i32
    scf.if %2 {
      %cst_12 = arith.constant 0.000000e+00 : f32
      %15 = vector.broadcast %cst_12 : f32 to vector<8x32xf32>
      %c0_13 = arith.constant 0 : index
      %c0_14 = arith.constant 0 : index
      %16 = vector.load %arg9[%c0_13, %c0_14] : memref<8x32xf32, #tpu.memory_space<vmem>>, vector<8x32xf32>
      tpu.vector_store %arg9[%c0_13, %c0_14], %15 {strides = array<i32>} : memref<8x32xf32, #tpu.memory_space<vmem>>, vector<8x32xf32>,
    } else {
    }
    %c0_i32_1 = arith.constant 0 : i32
    %3 = arith.cmpi eq, %arg1, %c0_i32_1 : i32
    %4 = arith.extui %3 : i1 to i32
    %c0_i32_2 = arith.constant 0 : i32
    %5 = arith.cmpi ne, %4, %c0_i32_2 : i32
    scf.if %5 {
      %c0_12 = arith.constant 0 : index
      %c0_13 = arith.constant 0 : index
      %15 = vector.load %arg3[%c0_12, %c0_13] : memref<8x256xf32, #tpu.memory_space<vmem>>, vector<8x256xf32>
      %cst_14 = arith.constant dense<0.000000e+00> : vector<8xf32>
      %16 = vector.multi_reduction <add>, %15, %cst_14 [1] : vector<8x256xf32> to vector<8xf32>
      %17 = vector.shape_cast %16 : vector<8xf32> to vector<8x1xf32>
      %cst_15 = arith.constant 2.560000e+02 : f32
      %18 = vector.broadcast %cst_15 : f32 to vector<8x1xf32>
      %19 = arith.divf %17, %18 : vector<8x1xf32>
      %20 = vector.broadcast %19 : vector<8x1xf32> to vector<8x256xf32>
      %21 = arith.subf %15, %20 : vector<8x256xf32>
      %22 = arith.mulf %21, %21 : vector<8x256xf32>
      %cst_16 = arith.constant dense<0.000000e+00> : vector<8xf32>
      %23 = vector.multi_reduction <add>, %22, %cst_16 [1] : vector<8x256xf32> to vector<8xf32>
      %24 = vector.shape_cast %23 : vector<8xf32> to vector<8x1xf32>
      %cst_17 = arith.constant 2.560000e+02 : f32
      %25 = vector.broadcast %cst_17 : f32 to vector<8x1xf32>
      %26 = arith.divf %24, %25 : vector<8x1xf32>
      %27 = vector.broadcast %19 : vector<8x1xf32> to vector<8x256xf32>
      %28 = arith.subf %15, %27 : vector<8x256xf32>
      %cst_18 = arith.constant 9.99999974E-6 : f32
      %29 = vector.broadcast %cst_18 : f32 to vector<8x1xf32>
      %30 = arith.addf %26, %29 : vector<8x1xf32>
      %31 = math.rsqrt %30 : vector<8x1xf32>
      %32 = vector.broadcast %31 : vector<8x1xf32> to vector<8x256xf32>
      %33 = arith.mulf %28, %32 : vector<8x256xf32>
      %c0_19 = arith.constant 0 : index
      %c0_20 = arith.constant 0 : index
      %34 = vector.load %arg5[%c0_19, %c0_20] : memref<1x256xf32, #tpu.memory_space<vmem>>, vector<1x256xf32>
      %35 = vector.broadcast %34 : vector<1x256xf32> to vector<8x256xf32>
      %36 = arith.mulf %33, %35 : vector<8x256xf32>
      %c0_21 = arith.constant 0 : index
      %c0_22 = arith.constant 0 : index
      %37 = vector.load %arg6[%c0_21, %c0_22] : memref<1x256xf32, #tpu.memory_space<vmem>>, vector<1x256xf32>
      %38 = vector.broadcast %37 : vector<1x256xf32> to vector<8x256xf32>
      %39 = arith.addf %36, %38 : vector<8x256xf32>
      %40 = arith.truncf %39 : vector<8x256xf32> to vector<8x256xbf16>
      %c0_23 = arith.constant 0 : index
      %c0_24 = arith.constant 0 : index
      %41 = vector.load %arg10[%c0_23, %c0_24] : memref<8x256xbf16, #tpu.memory_space<vmem>>, vector<8x256xbf16>
      tpu.vector_store %arg10[%c0_23, %c0_24], %40 {strides = array<i32>} : memref<8x256xbf16, #tpu.memory_space<vmem>>, vector<8x256xbf16>,
    } else {
    }
    %c0 = arith.constant 0 : index
    %c0_3 = arith.constant 0 : index
    %6 = vector.load %arg10[%c0, %c0_3] : memref<8x256xbf16, #tpu.memory_space<vmem>>, vector<8x256xbf16>
    %c0_4 = arith.constant 0 : index
    %c0_5 = arith.constant 0 : index
    %7 = vector.load %arg9[%c0_4, %c0_5] : memref<8x32xf32, #tpu.memory_space<vmem>>, vector<8x32xf32>
    %c0_6 = arith.constant 0 : index
    %c0_7 = arith.constant 0 : index
    %8 = vector.load %arg4[%c0_6, %c0_7] : memref<256x32xbf16, #tpu.memory_space<vmem>>, vector<256x32xbf16>
    %cst = arith.constant dense<0.000000e+00> : vector<8x32xf32>
    %9 = tpu.matmul %6, %8, %cst {dimension_numbers = #tpu.dot_dimension_numbers<[1], [0], [0], [1], [0, 0, 1, 1], [], []>} : vector<8x256xbf16>, vector<256x32xbf16>, vector<8x32xf32> -> vector<8x32xf32>
    %10 = arith.addf %7, %9 : vector<8x32xf32>
    %c0_8 = arith.constant 0 : index
    %c0_9 = arith.constant 0 : index
    %11 = vector.load %arg9[%c0_8, %c0_9] : memref<8x32xf32, #tpu.memory_space<vmem>>, vector<8x32xf32>
    tpu.vector_store %arg9[%c0_8, %c0_9], %10 {strides = array<i32>} : memref<8x32xf32, #tpu.memory_space<vmem>>, vector<8x32xf32>,
    %c0_i32_10 = arith.constant 0 : i32
    %12 = arith.cmpi eq, %arg2, %c0_i32_10 : i32
    %13 = arith.extui %12 : i1 to i32
    %c0_i32_11 = arith.constant 0 : i32
    %14 = arith.cmpi ne, %13, %c0_i32_11 : i32
    scf.if %14 {
      %c0_12 = arith.constant 0 : index
      %c0_13 = arith.constant 0 : index
      %15 = vector.load %arg9[%c0_12, %c0_13] : memref<8x32xf32, #tpu.memory_space<vmem>>, vector<8x32xf32>
      %c0_14 = arith.constant 0 : index
      %c0_15 = arith.constant 0 : index
      %16 = vector.load %arg7[%c0_14, %c0_15] : memref<1x32xf32, #tpu.memory_space<vmem>>, vector<1x32xf32>
      %17 = vector.broadcast %16 : vector<1x32xf32> to vector<8x32xf32>
      %18 = arith.addf %15, %17 : vector<8x32xf32>
      %19 = arith.truncf %18 : vector<8x32xf32> to vector<8x32xbf16>
      %c0_16 = arith.constant 0 : index
      %c0_17 = arith.constant 0 : index
      %20 = vector.load %arg8[%c0_16, %c0_17] : memref<8x32xbf16, #tpu.memory_space<vmem>>, vector<8x32xbf16>
      tpu.vector_store %arg8[%c0_16, %c0_17], %19 {strides = array<i32>} : memref<8x32xbf16, #tpu.memory_space<vmem>>, vector<8x32xbf16>,
    } else {
    }
    return
  }
  func.func @transform_0(%arg0: i32, %arg1: i32, %arg2: i32) -> (i32, i32) {
    %c0_i32 = arith.constant 0 : i32
    return %arg0, %arg2 : i32, i32
  }
  func.func @transform_1(%arg0: i32, %arg1: i32, %arg2: i32) -> (i32, i32) {
    %c0_i32 = arith.constant 0 : i32
    return %arg2, %arg1 : i32, i32
  }
  func.func @transform_2(%arg0: i32, %arg1: i32, %arg2: i32) -> (i32, i32) {
    %c0_i32 = arith.constant 0 : i32
    %c0_i32_0 = arith.constant 0 : i32
    return %c0_i32, %arg2 : i32, i32
  }
  func.func @transform_3(%arg0: i32, %arg1: i32, %arg2: i32) -> (i32, i32) {
    %c0_i32 = arith.constant 0 : i32
    %c0_i32_0 = arith.constant 0 : i32
    return %c0_i32, %arg2 : i32, i32
  }
  func.func @transform_4(%arg0: i32, %arg1: i32, %arg2: i32) -> (i32, i32) {
    %c0_i32 = arith.constant 0 : i32
    %c0_i32_0 = arith.constant 0 : i32
    return %c0_i32, %arg1 : i32, i32
  }
  func.func @transform_5(%arg0: i32, %arg1: i32, %arg2: i32) -> (i32, i32) {
    %c0_i32 = arith.constant 0 : i32
    return %arg0, %arg1 : i32, i32
  }
}

module attributes {stable_mosaic.version = 11 : i64} {
  func.func @_posadd_kernel(%arg0: i32, %arg1: memref<1x5x32xbf16, #tpu.memory_space<vmem>>, %arg2: memref<5x32xf32, #tpu.memory_space<vmem>>, %arg3: memref<1x5x32xbf16, #tpu.memory_space<vmem>>) attributes {dimension_semantics = [#tpu.dimension_semantics<parallel>], iteration_bounds = array<i64: 2>, scalar_prefetch = 0 : i64, scratch_operands = 0 : i64, tpu.core_type = #tpu.core_type<tc>, window_params = [{transform_indices = @transform_0, window_bounds = array<i64: 1, 5, 32>}, {pipeline_mode = #tpu.pipeline_mode<synchronous>, transform_indices = @transform_1, window_bounds = array<i64: 5, 32>}, {transform_indices = @transform_2, window_bounds = array<i64: 1, 5, 32>}]} {
    %c0 = arith.constant 0 : index
    %c0_0 = arith.constant 0 : index
    %c0_1 = arith.constant 0 : index
    %0 = vector.load %arg1[%c0, %c0_0, %c0_1] : memref<1x5x32xbf16, #tpu.memory_space<vmem>>, vector<1x5x32xbf16>
    %1 = arith.extf %0 : vector<1x5x32xbf16> to vector<1x5x32xf32>
    %c0_2 = arith.constant 0 : index
    %c0_3 = arith.constant 0 : index
    %2 = vector.load %arg2[%c0_2, %c0_3] : memref<5x32xf32, #tpu.memory_space<vmem>>, vector<5x32xf32>
    %3 = vector.shape_cast %2 : vector<5x32xf32> to vector<1x5x32xf32>
    %4 = arith.addf %1, %3 : vector<1x5x32xf32>
    %5 = arith.truncf %4 : vector<1x5x32xf32> to vector<1x5x32xbf16>
    %c0_4 = arith.constant 0 : index
    %c0_5 = arith.constant 0 : index
    %c0_6 = arith.constant 0 : index
    %6 = vector.load %arg3[%c0_4, %c0_5, %c0_6] : memref<1x5x32xbf16, #tpu.memory_space<vmem>>, vector<1x5x32xbf16>
    tpu.vector_store %arg3[%c0_4, %c0_5, %c0_6], %5 {strides = array<i32>} : memref<1x5x32xbf16, #tpu.memory_space<vmem>>, vector<1x5x32xbf16>,
    return
  }
  func.func @transform_0(%arg0: i32) -> (i32, i32, i32) {
    %c0_i32 = arith.constant 0 : i32
    %c0_i32_0 = arith.constant 0 : i32
    %c0_i32_1 = arith.constant 0 : i32
    return %arg0, %c0_i32, %c0_i32_0 : i32, i32, i32
  }
  func.func @transform_1(%arg0: i32) -> (i32, i32) {
    %c0_i32 = arith.constant 0 : i32
    %c0_i32_0 = arith.constant 0 : i32
    %c0_i32_1 = arith.constant 0 : i32
    return %c0_i32, %c0_i32_0 : i32, i32
  }
  func.func @transform_2(%arg0: i32) -> (i32, i32, i32) {
    %c0_i32 = arith.constant 0 : i32
    %c0_i32_0 = arith.constant 0 : i32
    %c0_i32_1 = arith.constant 0 : i32
    return %arg0, %c0_i32, %c0_i32_0 : i32, i32, i32
  }
}

module attributes {stable_mosaic.version = 11 : i64} {
  func.func @kernel(%arg0: i32, %arg1: i32, %arg2: i32, %arg3: memref<10x32xbf16, #tpu.memory_space<vmem>>, %arg4: memref<32x96xbf16, #tpu.memory_space<vmem>>, %arg5: memref<1x32xf32, #tpu.memory_space<vmem>>, %arg6: memref<1x32xf32, #tpu.memory_space<vmem>>, %arg7: memref<10x96xbf16, #tpu.memory_space<vmem>>, %arg8: memref<10x96xf32, #tpu.memory_space<vmem>>, %arg9: memref<10x32xbf16, #tpu.memory_space<vmem>>) attributes {dimension_semantics = [#tpu.dimension_semantics<parallel>, #tpu.dimension_semantics<arbitrary>, #tpu.dimension_semantics<arbitrary>], iteration_bounds = array<i64: 1, 1, 1>, scalar_prefetch = 0 : i64, scratch_operands = 2 : i64, tpu.core_type = #tpu.core_type<tc>, window_params = [{transform_indices = @transform_0, window_bounds = array<i64: 10, 32>}, {transform_indices = @transform_1, window_bounds = array<i64: 32, 96>}, {transform_indices = @transform_2, window_bounds = array<i64: 1, 32>}, {transform_indices = @transform_3, window_bounds = array<i64: 1, 32>}, {transform_indices = @transform_4, window_bounds = array<i64: 10, 96>}]} {
    %c0_i32 = arith.constant 0 : i32
    %0 = arith.cmpi eq, %arg2, %c0_i32 : i32
    %1 = arith.extui %0 : i1 to i32
    %c0_i32_0 = arith.constant 0 : i32
    %2 = arith.cmpi ne, %1, %c0_i32_0 : i32
    scf.if %2 {
      %cst_12 = arith.constant 0.000000e+00 : f32
      %15 = vector.broadcast %cst_12 : f32 to vector<10x96xf32>
      %c0_13 = arith.constant 0 : index
      %c0_14 = arith.constant 0 : index
      %16 = vector.load %arg8[%c0_13, %c0_14] : memref<10x96xf32, #tpu.memory_space<vmem>>, vector<10x96xf32>
      tpu.vector_store %arg8[%c0_13, %c0_14], %15 {strides = array<i32>} : memref<10x96xf32, #tpu.memory_space<vmem>>, vector<10x96xf32>,
    } else {
    }
    %c0_i32_1 = arith.constant 0 : i32
    %3 = arith.cmpi eq, %arg1, %c0_i32_1 : i32
    %4 = arith.extui %3 : i1 to i32
    %c0_i32_2 = arith.constant 0 : i32
    %5 = arith.cmpi ne, %4, %c0_i32_2 : i32
    scf.if %5 {
      %c0_12 = arith.constant 0 : index
      %c0_13 = arith.constant 0 : index
      %15 = vector.load %arg3[%c0_12, %c0_13] : memref<10x32xbf16, #tpu.memory_space<vmem>>, vector<10x32xbf16>
      %16 = arith.extf %15 : vector<10x32xbf16> to vector<10x32xf32>
      %cst_14 = arith.constant dense<0.000000e+00> : vector<10xf32>
      %17 = vector.multi_reduction <add>, %16, %cst_14 [1] : vector<10x32xf32> to vector<10xf32>
      %18 = vector.shape_cast %17 : vector<10xf32> to vector<10x1xf32>
      %cst_15 = arith.constant 3.200000e+01 : f32
      %19 = vector.broadcast %cst_15 : f32 to vector<10x1xf32>
      %20 = arith.divf %18, %19 : vector<10x1xf32>
      %21 = vector.broadcast %20 : vector<10x1xf32> to vector<10x32xf32>
      %22 = arith.subf %16, %21 : vector<10x32xf32>
      %23 = arith.mulf %22, %22 : vector<10x32xf32>
      %cst_16 = arith.constant dense<0.000000e+00> : vector<10xf32>
      %24 = vector.multi_reduction <add>, %23, %cst_16 [1] : vector<10x32xf32> to vector<10xf32>
      %25 = vector.shape_cast %24 : vector<10xf32> to vector<10x1xf32>
      %cst_17 = arith.constant 3.200000e+01 : f32
      %26 = vector.broadcast %cst_17 : f32 to vector<10x1xf32>
      %27 = arith.divf %25, %26 : vector<10x1xf32>
      %28 = vector.broadcast %20 : vector<10x1xf32> to vector<10x32xf32>
      %29 = arith.subf %16, %28 : vector<10x32xf32>
      %cst_18 = arith.constant 9.99999974E-6 : f32
      %30 = vector.broadcast %cst_18 : f32 to vector<10x1xf32>
      %31 = arith.addf %27, %30 : vector<10x1xf32>
      %32 = math.rsqrt %31 : vector<10x1xf32>
      %33 = vector.broadcast %32 : vector<10x1xf32> to vector<10x32xf32>
      %34 = arith.mulf %29, %33 : vector<10x32xf32>
      %c0_19 = arith.constant 0 : index
      %c0_20 = arith.constant 0 : index
      %35 = vector.load %arg5[%c0_19, %c0_20] : memref<1x32xf32, #tpu.memory_space<vmem>>, vector<1x32xf32>
      %36 = vector.broadcast %35 : vector<1x32xf32> to vector<10x32xf32>
      %37 = arith.mulf %34, %36 : vector<10x32xf32>
      %c0_21 = arith.constant 0 : index
      %c0_22 = arith.constant 0 : index
      %38 = vector.load %arg6[%c0_21, %c0_22] : memref<1x32xf32, #tpu.memory_space<vmem>>, vector<1x32xf32>
      %39 = vector.broadcast %38 : vector<1x32xf32> to vector<10x32xf32>
      %40 = arith.addf %37, %39 : vector<10x32xf32>
      %41 = arith.truncf %40 : vector<10x32xf32> to vector<10x32xbf16>
      %c0_23 = arith.constant 0 : index
      %c0_24 = arith.constant 0 : index
      %42 = vector.load %arg9[%c0_23, %c0_24] : memref<10x32xbf16, #tpu.memory_space<vmem>>, vector<10x32xbf16>
      tpu.vector_store %arg9[%c0_23, %c0_24], %41 {strides = array<i32>} : memref<10x32xbf16, #tpu.memory_space<vmem>>, vector<10x32xbf16>,
    } else {
    }
    %c0 = arith.constant 0 : index
    %c0_3 = arith.constant 0 : index
    %6 = vector.load %arg9[%c0, %c0_3] : memref<10x32xbf16, #tpu.memory_space<vmem>>, vector<10x32xbf16>
    %c0_4 = arith.constant 0 : index
    %c0_5 = arith.constant 0 : index
    %7 = vector.load %arg8[%c0_4, %c0_5] : memref<10x96xf32, #tpu.memory_space<vmem>>, vector<10x96xf32>
    %c0_6 = arith.constant 0 : index
    %c0_7 = arith.constant 0 : index
    %8 = vector.load %arg4[%c0_6, %c0_7] : memref<32x96xbf16, #tpu.memory_space<vmem>>, vector<32x96xbf16>
    %cst = arith.constant dense<0.000000e+00> : vector<10x96xf32>
    %9 = tpu.matmul %6, %8, %cst {dimension_numbers = #tpu.dot_dimension_numbers<[1], [0], [0], [1], [0, 0, 1, 1], [], []>} : vector<10x32xbf16>, vector<32x96xbf16>, vector<10x96xf32> -> vector<10x96xf32>
    %10 = arith.addf %7, %9 : vector<10x96xf32>
    %c0_8 = arith.constant 0 : index
    %c0_9 = arith.constant 0 : index
    %11 = vector.load %arg8[%c0_8, %c0_9] : memref<10x96xf32, #tpu.memory_space<vmem>>, vector<10x96xf32>
    tpu.vector_store %arg8[%c0_8, %c0_9], %10 {strides = array<i32>} : memref<10x96xf32, #tpu.memory_space<vmem>>, vector<10x96xf32>,
    %c0_i32_10 = arith.constant 0 : i32
    %12 = arith.cmpi eq, %arg2, %c0_i32_10 : i32
    %13 = arith.extui %12 : i1 to i32
    %c0_i32_11 = arith.constant 0 : i32
    %14 = arith.cmpi ne, %13, %c0_i32_11 : i32
    scf.if %14 {
      %c0_12 = arith.constant 0 : index
      %c0_13 = arith.constant 0 : index
      %15 = vector.load %arg8[%c0_12, %c0_13] : memref<10x96xf32, #tpu.memory_space<vmem>>, vector<10x96xf32>
      %16 = arith.truncf %15 : vector<10x96xf32> to vector<10x96xbf16>
      %c0_14 = arith.constant 0 : index
      %c0_15 = arith.constant 0 : index
      %17 = vector.load %arg7[%c0_14, %c0_15] : memref<10x96xbf16, #tpu.memory_space<vmem>>, vector<10x96xbf16>
      tpu.vector_store %arg7[%c0_14, %c0_15], %16 {strides = array<i32>} : memref<10x96xbf16, #tpu.memory_space<vmem>>, vector<10x96xbf16>,
    } else {
    }
    return
  }
  func.func @transform_0(%arg0: i32, %arg1: i32, %arg2: i32) -> (i32, i32) {
    %c0_i32 = arith.constant 0 : i32
    return %arg0, %arg2 : i32, i32
  }
  func.func @transform_1(%arg0: i32, %arg1: i32, %arg2: i32) -> (i32, i32) {
    %c0_i32 = arith.constant 0 : i32
    return %arg2, %arg1 : i32, i32
  }
  func.func @transform_2(%arg0: i32, %arg1: i32, %arg2: i32) -> (i32, i32) {
    %c0_i32 = arith.constant 0 : i32
    %c0_i32_0 = arith.constant 0 : i32
    return %c0_i32, %arg2 : i32, i32
  }
  func.func @transform_3(%arg0: i32, %arg1: i32, %arg2: i32) -> (i32, i32) {
    %c0_i32 = arith.constant 0 : i32
    %c0_i32_0 = arith.constant 0 : i32
    return %c0_i32, %arg2 : i32, i32
  }
  func.func @transform_4(%arg0: i32, %arg1: i32, %arg2: i32) -> (i32, i32) {
    %c0_i32 = arith.constant 0 : i32
    return %arg0, %arg1 : i32, i32
  }
}

module attributes {stable_mosaic.version = 11 : i64} {
  func.func @_attn_kernel(%arg0: i32, %arg1: i32, %arg2: memref<1x5x96xbf16, #tpu.memory_space<vmem>>, %arg3: memref<1x5x32xbf16, #tpu.memory_space<vmem>>) attributes {dimension_semantics = [#tpu.dimension_semantics<parallel>, #tpu.dimension_semantics<parallel>], iteration_bounds = array<i64: 2, 1>, scalar_prefetch = 0 : i64, scratch_operands = 0 : i64, tpu.core_type = #tpu.core_type<tc>, window_params = [{transform_indices = @transform_0, window_bounds = array<i64: 1, 5, 96>}, {transform_indices = @transform_1, window_bounds = array<i64: 1, 5, 32>}]} {
    %c0 = arith.constant 0 : index
    %c0_0 = arith.constant 0 : index
    %c0_1 = arith.constant 0 : index
    %0 = vector.load %arg2[%c0, %c0_0, %c0_1] : memref<1x5x96xbf16, #tpu.memory_space<vmem>>, vector<1x5x96xbf16>
    %1 = vector.shape_cast %0 : vector<1x5x96xbf16> to vector<5x96xbf16>
    %2 = vector.extract_strided_slice %1 {offsets = [0, 0], sizes = [5, 32], strides = [1, 1]} : vector<5x96xbf16> to vector<5x32xbf16>
    %3 = vector.shape_cast %2 : vector<5x32xbf16> to vector<5x2x16xbf16>
    %4 = vector.extract_strided_slice %1 {offsets = [0, 32], sizes = [5, 32], strides = [1, 1]} : vector<5x96xbf16> to vector<5x32xbf16>
    %5 = vector.shape_cast %4 : vector<5x32xbf16> to vector<5x2x16xbf16>
    %6 = vector.extract_strided_slice %1 {offsets = [0, 64], sizes = [5, 32], strides = [1, 1]} : vector<5x96xbf16> to vector<5x32xbf16>
    %7 = vector.shape_cast %6 : vector<5x32xbf16> to vector<5x2x16xbf16>
    "tpu.trace_start"() <{level = 10 : i32, message = "qhd,khd->hqk"}> : () -> ()
    %cst = arith.constant dense<0.000000e+00> : vector<2x5x5xf32>
    %8 = tpu.matmul %3, %5, %cst {dimension_numbers = #tpu.dot_dimension_numbers<[2], [2], [0], [0], [0, 1, 0, 0, 1, 0], [1], [1]>} : vector<5x2x16xbf16>, vector<5x2x16xbf16>, vector<2x5x5xf32> -> vector<2x5x5xf32>
    "tpu.trace_stop"() : () -> ()
    %cst_2 = arith.constant dense<0xFF800000> : vector<2x5xf32>
    %9 = vector.multi_reduction <maximumf>, %8, %cst_2 [2] : vector<2x5x5xf32> to vector<2x5xf32>
    %10 = vector.shape_cast %9 : vector<2x5xf32> to vector<2x5x1xf32>
    %11 = vector.broadcast %10 : vector<2x5x1xf32> to vector<2x5x5xf32>
    %12 = arith.subf %8, %11 : vector<2x5x5xf32>
    %13 = math.exp %12 : vector<2x5x5xf32>
    %cst_3 = arith.constant dense<0.000000e+00> : vector<2x5xf32>
    %14 = vector.multi_reduction <add>, %13, %cst_3 [2] : vector<2x5x5xf32> to vector<2x5xf32>
    %15 = vector.shape_cast %14 : vector<2x5xf32> to vector<2x5x1xf32>
    %16 = arith.truncf %13 : vector<2x5x5xf32> to vector<2x5x5xbf16>
    "tpu.trace_start"() <{level = 10 : i32, message = "hqk,khd->hqd"}> : () -> ()
    %cst_4 = arith.constant dense<0.000000e+00> : vector<2x5x16xf32>
    %17 = tpu.matmul %16, %7, %cst_4 {dimension_numbers = #tpu.dot_dimension_numbers<[2], [0], [1], [2], [0, 0, 0, 1, 1, 2], [0], [1]>} : vector<2x5x5xbf16>, vector<5x2x16xbf16>, vector<2x5x16xf32> -> vector<2x5x16xf32>
    "tpu.trace_stop"() : () -> ()
    %18 = tpu.reciprocal %15 {approx = true} : vector<2x5x1xf32> -> vector<2x5x1xf32>
    %19 = vector.broadcast %18 : vector<2x5x1xf32> to vector<2x5x16xf32>
    %20 = arith.mulf %17, %19 : vector<2x5x16xf32>
    %21 = vector.extract_strided_slice %20 {offsets = [0, 0, 0], sizes = [1, 5, 16], strides = [1, 1, 1]} : vector<2x5x16xf32> to vector<1x5x16xf32>
    %22 = vector.shape_cast %21 : vector<1x5x16xf32> to vector<5x16xf32>
    %23 = arith.truncf %22 : vector<5x16xf32> to vector<5x16xbf16>
    %24 = vector.extract_strided_slice %20 {offsets = [1, 0, 0], sizes = [1, 5, 16], strides = [1, 1, 1]} : vector<2x5x16xf32> to vector<1x5x16xf32>
    %25 = vector.shape_cast %24 : vector<1x5x16xf32> to vector<5x16xf32>
    %26 = arith.truncf %25 : vector<5x16xf32> to vector<5x16xbf16>
    %27 = tpu.concatenate %23, %26 in 1 : vector<5x16xbf16>, vector<5x16xbf16> -> vector<5x32xbf16>
    %c0_5 = arith.constant 0 : index
    %c0_6 = arith.constant 0 : index
    %c0_7 = arith.constant 0 : index
    %28 = vector.load %arg3[%c0_5, %c0_6, %c0_7] : memref<1x5x32xbf16, #tpu.memory_space<vmem>>, vector<1x5x32xbf16>
    %29 = vector.shape_cast %28 : vector<1x5x32xbf16> to vector<5x32xbf16>
    %30 = vector.shape_cast %27 : vector<5x32xbf16> to vector<1x5x32xbf16>
    tpu.vector_store %arg3[%c0_5, %c0_6, %c0_7], %30 {strides = array<i32>} : memref<1x5x32xbf16, #tpu.memory_space<vmem>>, vector<1x5x32xbf16>,
    return
  }
  func.func @transform_0(%arg0: i32, %arg1: i32) -> (i32, i32, i32) {
    %c0_i32 = arith.constant 0 : i32
    %c0_i32_0 = arith.constant 0 : i32
    return %arg0, %c0_i32, %arg1 : i32, i32, i32
  }
  func.func @transform_1(%arg0: i32, %arg1: i32) -> (i32, i32, i32) {
    %c0_i32 = arith.constant 0 : i32
    %c0_i32_0 = arith.constant 0 : i32
    return %arg0, %c0_i32, %arg1 : i32, i32, i32
  }
}

module attributes {stable_mosaic.version = 11 : i64} {
  func.func @kernel(%arg0: i32, %arg1: i32, %arg2: i32, %arg3: memref<10x32xbf16, #tpu.memory_space<vmem>>, %arg4: memref<32x64xbf16, #tpu.memory_space<vmem>>, %arg5: memref<1x32xf32, #tpu.memory_space<vmem>>, %arg6: memref<1x32xf32, #tpu.memory_space<vmem>>, %arg7: memref<1x64xf32, #tpu.memory_space<vmem>>, %arg8: memref<10x64xbf16, #tpu.memory_space<vmem>>, %arg9: memref<10x64xf32, #tpu.memory_space<vmem>>, %arg10: memref<10x32xbf16, #tpu.memory_space<vmem>>) attributes {dimension_semantics = [#tpu.dimension_semantics<parallel>, #tpu.dimension_semantics<arbitrary>, #tpu.dimension_semantics<arbitrary>], iteration_bounds = array<i64: 1, 1, 1>, scalar_prefetch = 0 : i64, scratch_operands = 2 : i64, tpu.core_type = #tpu.core_type<tc>, window_params = [{transform_indices = @transform_0, window_bounds = array<i64: 10, 32>}, {transform_indices = @transform_1, window_bounds = array<i64: 32, 64>}, {transform_indices = @transform_2, window_bounds = array<i64: 1, 32>}, {transform_indices = @transform_3, window_bounds = array<i64: 1, 32>}, {transform_indices = @transform_4, window_bounds = array<i64: 1, 64>}, {transform_indices = @transform_5, window_bounds = array<i64: 10, 64>}]} {
    %c0_i32 = arith.constant 0 : i32
    %0 = arith.cmpi eq, %arg2, %c0_i32 : i32
    %1 = arith.extui %0 : i1 to i32
    %c0_i32_0 = arith.constant 0 : i32
    %2 = arith.cmpi ne, %1, %c0_i32_0 : i32
    scf.if %2 {
      %cst_12 = arith.constant 0.000000e+00 : f32
      %15 = vector.broadcast %cst_12 : f32 to vector<10x64xf32>
      %c0_13 = arith.constant 0 : index
      %c0_14 = arith.constant 0 : index
      %16 = vector.load %arg9[%c0_13, %c0_14] : memref<10x64xf32, #tpu.memory_space<vmem>>, vector<10x64xf32>
      tpu.vector_store %arg9[%c0_13, %c0_14], %15 {strides = array<i32>} : memref<10x64xf32, #tpu.memory_space<vmem>>, vector<10x64xf32>,
    } else {
    }
    %c0_i32_1 = arith.constant 0 : i32
    %3 = arith.cmpi eq, %arg1, %c0_i32_1 : i32
    %4 = arith.extui %3 : i1 to i32
    %c0_i32_2 = arith.constant 0 : i32
    %5 = arith.cmpi ne, %4, %c0_i32_2 : i32
    scf.if %5 {
      %c0_12 = arith.constant 0 : index
      %c0_13 = arith.constant 0 : index
      %15 = vector.load %arg3[%c0_12, %c0_13] : memref<10x32xbf16, #tpu.memory_space<vmem>>, vector<10x32xbf16>
      %16 = arith.extf %15 : vector<10x32xbf16> to vector<10x32xf32>
      %cst_14 = arith.constant dense<0.000000e+00> : vector<10xf32>
      %17 = vector.multi_reduction <add>, %16, %cst_14 [1] : vector<10x32xf32> to vector<10xf32>
      %18 = vector.shape_cast %17 : vector<10xf32> to vector<10x1xf32>
      %cst_15 = arith.constant 3.200000e+01 : f32
      %19 = vector.broadcast %cst_15 : f32 to vector<10x1xf32>
      %20 = arith.divf %18, %19 : vector<10x1xf32>
      %21 = vector.broadcast %20 : vector<10x1xf32> to vector<10x32xf32>
      %22 = arith.subf %16, %21 : vector<10x32xf32>
      %23 = arith.mulf %22, %22 : vector<10x32xf32>
      %cst_16 = arith.constant dense<0.000000e+00> : vector<10xf32>
      %24 = vector.multi_reduction <add>, %23, %cst_16 [1] : vector<10x32xf32> to vector<10xf32>
      %25 = vector.shape_cast %24 : vector<10xf32> to vector<10x1xf32>
      %cst_17 = arith.constant 3.200000e+01 : f32
      %26 = vector.broadcast %cst_17 : f32 to vector<10x1xf32>
      %27 = arith.divf %25, %26 : vector<10x1xf32>
      %28 = vector.broadcast %20 : vector<10x1xf32> to vector<10x32xf32>
      %29 = arith.subf %16, %28 : vector<10x32xf32>
      %cst_18 = arith.constant 9.99999974E-6 : f32
      %30 = vector.broadcast %cst_18 : f32 to vector<10x1xf32>
      %31 = arith.addf %27, %30 : vector<10x1xf32>
      %32 = math.rsqrt %31 : vector<10x1xf32>
      %33 = vector.broadcast %32 : vector<10x1xf32> to vector<10x32xf32>
      %34 = arith.mulf %29, %33 : vector<10x32xf32>
      %c0_19 = arith.constant 0 : index
      %c0_20 = arith.constant 0 : index
      %35 = vector.load %arg5[%c0_19, %c0_20] : memref<1x32xf32, #tpu.memory_space<vmem>>, vector<1x32xf32>
      %36 = vector.broadcast %35 : vector<1x32xf32> to vector<10x32xf32>
      %37 = arith.mulf %34, %36 : vector<10x32xf32>
      %c0_21 = arith.constant 0 : index
      %c0_22 = arith.constant 0 : index
      %38 = vector.load %arg6[%c0_21, %c0_22] : memref<1x32xf32, #tpu.memory_space<vmem>>, vector<1x32xf32>
      %39 = vector.broadcast %38 : vector<1x32xf32> to vector<10x32xf32>
      %40 = arith.addf %37, %39 : vector<10x32xf32>
      %41 = arith.truncf %40 : vector<10x32xf32> to vector<10x32xbf16>
      %c0_23 = arith.constant 0 : index
      %c0_24 = arith.constant 0 : index
      %42 = vector.load %arg10[%c0_23, %c0_24] : memref<10x32xbf16, #tpu.memory_space<vmem>>, vector<10x32xbf16>
      tpu.vector_store %arg10[%c0_23, %c0_24], %41 {strides = array<i32>} : memref<10x32xbf16, #tpu.memory_space<vmem>>, vector<10x32xbf16>,
    } else {
    }
    %c0 = arith.constant 0 : index
    %c0_3 = arith.constant 0 : index
    %6 = vector.load %arg10[%c0, %c0_3] : memref<10x32xbf16, #tpu.memory_space<vmem>>, vector<10x32xbf16>
    %c0_4 = arith.constant 0 : index
    %c0_5 = arith.constant 0 : index
    %7 = vector.load %arg9[%c0_4, %c0_5] : memref<10x64xf32, #tpu.memory_space<vmem>>, vector<10x64xf32>
    %c0_6 = arith.constant 0 : index
    %c0_7 = arith.constant 0 : index
    %8 = vector.load %arg4[%c0_6, %c0_7] : memref<32x64xbf16, #tpu.memory_space<vmem>>, vector<32x64xbf16>
    %cst = arith.constant dense<0.000000e+00> : vector<10x64xf32>
    %9 = tpu.matmul %6, %8, %cst {dimension_numbers = #tpu.dot_dimension_numbers<[1], [0], [0], [1], [0, 0, 1, 1], [], []>} : vector<10x32xbf16>, vector<32x64xbf16>, vector<10x64xf32> -> vector<10x64xf32>
    %10 = arith.addf %7, %9 : vector<10x64xf32>
    %c0_8 = arith.constant 0 : index
    %c0_9 = arith.constant 0 : index
    %11 = vector.load %arg9[%c0_8, %c0_9] : memref<10x64xf32, #tpu.memory_space<vmem>>, vector<10x64xf32>
    tpu.vector_store %arg9[%c0_8, %c0_9], %10 {strides = array<i32>} : memref<10x64xf32, #tpu.memory_space<vmem>>, vector<10x64xf32>,
    %c0_i32_10 = arith.constant 0 : i32
    %12 = arith.cmpi eq, %arg2, %c0_i32_10 : i32
    %13 = arith.extui %12 : i1 to i32
    %c0_i32_11 = arith.constant 0 : i32
    %14 = arith.cmpi ne, %13, %c0_i32_11 : i32
    scf.if %14 {
      %c0_12 = arith.constant 0 : index
      %c0_13 = arith.constant 0 : index
      %15 = vector.load %arg9[%c0_12, %c0_13] : memref<10x64xf32, #tpu.memory_space<vmem>>, vector<10x64xf32>
      %c0_14 = arith.constant 0 : index
      %c0_15 = arith.constant 0 : index
      %16 = vector.load %arg7[%c0_14, %c0_15] : memref<1x64xf32, #tpu.memory_space<vmem>>, vector<1x64xf32>
      %17 = vector.broadcast %16 : vector<1x64xf32> to vector<10x64xf32>
      %18 = arith.addf %15, %17 : vector<10x64xf32>
      %cst_16 = arith.constant 5.000000e-01 : f32
      %19 = vector.broadcast %cst_16 : f32 to vector<10x64xf32>
      %20 = arith.mulf %19, %18 : vector<10x64xf32>
      %21 = arith.mulf %18, %18 : vector<10x64xf32>
      %22 = arith.mulf %21, %18 : vector<10x64xf32>
      %cst_17 = arith.constant 4.471500e-02 : f32
      %23 = vector.broadcast %cst_17 : f32 to vector<10x64xf32>
      %24 = arith.mulf %23, %22 : vector<10x64xf32>
      %25 = arith.addf %18, %24 : vector<10x64xf32>
      %cst_18 = arith.constant 0.797884583 : f32
      %26 = vector.broadcast %cst_18 : f32 to vector<10x64xf32>
      %27 = arith.mulf %26, %25 : vector<10x64xf32>
      %28 = math.tanh %27 : vector<10x64xf32>
      %cst_19 = arith.constant 1.000000e+00 : f32
      %29 = vector.broadcast %cst_19 : f32 to vector<10x64xf32>
      %30 = arith.addf %29, %28 : vector<10x64xf32>
      %31 = arith.mulf %20, %30 : vector<10x64xf32>
      %32 = arith.truncf %31 : vector<10x64xf32> to vector<10x64xbf16>
      %c0_20 = arith.constant 0 : index
      %c0_21 = arith.constant 0 : index
      %33 = vector.load %arg8[%c0_20, %c0_21] : memref<10x64xbf16, #tpu.memory_space<vmem>>, vector<10x64xbf16>
      tpu.vector_store %arg8[%c0_20, %c0_21], %32 {strides = array<i32>} : memref<10x64xbf16, #tpu.memory_space<vmem>>, vector<10x64xbf16>,
    } else {
    }
    return
  }
  func.func @transform_0(%arg0: i32, %arg1: i32, %arg2: i32) -> (i32, i32) {
    %c0_i32 = arith.constant 0 : i32
    return %arg0, %arg2 : i32, i32
  }
  func.func @transform_1(%arg0: i32, %arg1: i32, %arg2: i32) -> (i32, i32) {
    %c0_i32 = arith.constant 0 : i32
    return %arg2, %arg1 : i32, i32
  }
  func.func @transform_2(%arg0: i32, %arg1: i32, %arg2: i32) -> (i32, i32) {
    %c0_i32 = arith.constant 0 : i32
    %c0_i32_0 = arith.constant 0 : i32
    return %c0_i32, %arg2 : i32, i32
  }
  func.func @transform_3(%arg0: i32, %arg1: i32, %arg2: i32) -> (i32, i32) {
    %c0_i32 = arith.constant 0 : i32
    %c0_i32_0 = arith.constant 0 : i32
    return %c0_i32, %arg2 : i32, i32
  }
  func.func @transform_4(%arg0: i32, %arg1: i32, %arg2: i32) -> (i32, i32) {
    %c0_i32 = arith.constant 0 : i32
    %c0_i32_0 = arith.constant 0 : i32
    return %c0_i32, %arg1 : i32, i32
  }
  func.func @transform_5(%arg0: i32, %arg1: i32, %arg2: i32) -> (i32, i32) {
    %c0_i32 = arith.constant 0 : i32
    return %arg0, %arg1 : i32, i32
  }
}

module attributes {stable_mosaic.version = 11 : i64} {
  func.func @kernel(%arg0: i32, %arg1: i32, %arg2: i32, %arg3: memref<10x32xbf16, #tpu.memory_space<vmem>>, %arg4: memref<32x32xbf16, #tpu.memory_space<vmem>>, %arg5: memref<1x32xf32, #tpu.memory_space<vmem>>, %arg6: memref<10x32xbf16, #tpu.memory_space<vmem>>, %arg7: memref<10x32xbf16, #tpu.memory_space<vmem>>, %arg8: memref<10x32xf32, #tpu.memory_space<vmem>>) attributes {dimension_semantics = [#tpu.dimension_semantics<parallel>, #tpu.dimension_semantics<parallel>, #tpu.dimension_semantics<arbitrary>], iteration_bounds = array<i64: 1, 1, 1>, scalar_prefetch = 0 : i64, scratch_operands = 1 : i64, tpu.core_type = #tpu.core_type<tc>, window_params = [{transform_indices = @transform_0, window_bounds = array<i64: 10, 32>}, {transform_indices = @transform_1, window_bounds = array<i64: 32, 32>}, {transform_indices = @transform_2, window_bounds = array<i64: 1, 32>}, {transform_indices = @transform_3, window_bounds = array<i64: 10, 32>}, {transform_indices = @transform_4, window_bounds = array<i64: 10, 32>}]} {
    %c0_i32 = arith.constant 0 : i32
    %0 = arith.cmpi eq, %arg2, %c0_i32 : i32
    %1 = arith.extui %0 : i1 to i32
    %c0_i32_0 = arith.constant 0 : i32
    %2 = arith.cmpi ne, %1, %c0_i32_0 : i32
    scf.if %2 {
      %cst_10 = arith.constant 0.000000e+00 : f32
      %12 = vector.broadcast %cst_10 : f32 to vector<10x32xf32>
      %c0_11 = arith.constant 0 : index
      %c0_12 = arith.constant 0 : index
      %13 = vector.load %arg8[%c0_11, %c0_12] : memref<10x32xf32, #tpu.memory_space<vmem>>, vector<10x32xf32>
      tpu.vector_store %arg8[%c0_11, %c0_12], %12 {strides = array<i32>} : memref<10x32xf32, #tpu.memory_space<vmem>>, vector<10x32xf32>,
    } else {
    }
    %c0 = arith.constant 0 : index
    %c0_1 = arith.constant 0 : index
    %3 = vector.load %arg3[%c0, %c0_1] : memref<10x32xbf16, #tpu.memory_space<vmem>>, vector<10x32xbf16>
    %c0_2 = arith.constant 0 : index
    %c0_3 = arith.constant 0 : index
    %4 = vector.load %arg8[%c0_2, %c0_3] : memref<10x32xf32, #tpu.memory_space<vmem>>, vector<10x32xf32>
    %c0_4 = arith.constant 0 : index
    %c0_5 = arith.constant 0 : index
    %5 = vector.load %arg4[%c0_4, %c0_5] : memref<32x32xbf16, #tpu.memory_space<vmem>>, vector<32x32xbf16>
    %cst = arith.constant dense<0.000000e+00> : vector<10x32xf32>
    %6 = tpu.matmul %3, %5, %cst {dimension_numbers = #tpu.dot_dimension_numbers<[1], [0], [0], [1], [0, 0, 1, 1], [], []>} : vector<10x32xbf16>, vector<32x32xbf16>, vector<10x32xf32> -> vector<10x32xf32>
    %7 = arith.addf %4, %6 : vector<10x32xf32>
    %c0_6 = arith.constant 0 : index
    %c0_7 = arith.constant 0 : index
    %8 = vector.load %arg8[%c0_6, %c0_7] : memref<10x32xf32, #tpu.memory_space<vmem>>, vector<10x32xf32>
    tpu.vector_store %arg8[%c0_6, %c0_7], %7 {strides = array<i32>} : memref<10x32xf32, #tpu.memory_space<vmem>>, vector<10x32xf32>,
    %c0_i32_8 = arith.constant 0 : i32
    %9 = arith.cmpi eq, %arg2, %c0_i32_8 : i32
    %10 = arith.extui %9 : i1 to i32
    %c0_i32_9 = arith.constant 0 : i32
    %11 = arith.cmpi ne, %10, %c0_i32_9 : i32
    scf.if %11 {
      %c0_10 = arith.constant 0 : index
      %c0_11 = arith.constant 0 : index
      %12 = vector.load %arg8[%c0_10, %c0_11] : memref<10x32xf32, #tpu.memory_space<vmem>>, vector<10x32xf32>
      %c0_12 = arith.constant 0 : index
      %c0_13 = arith.constant 0 : index
      %13 = vector.load %arg5[%c0_12, %c0_13] : memref<1x32xf32, #tpu.memory_space<vmem>>, vector<1x32xf32>
      %14 = vector.broadcast %13 : vector<1x32xf32> to vector<10x32xf32>
      %15 = arith.addf %12, %14 : vector<10x32xf32>
      %c0_14 = arith.constant 0 : index
      %c0_15 = arith.constant 0 : index
      %16 = vector.load %arg6[%c0_14, %c0_15] : memref<10x32xbf16, #tpu.memory_space<vmem>>, vector<10x32xbf16>
      %17 = arith.extf %16 : vector<10x32xbf16> to vector<10x32xf32>
      %18 = arith.addf %15, %17 : vector<10x32xf32>
      %19 = arith.truncf %18 : vector<10x32xf32> to vector<10x32xbf16>
      %c0_16 = arith.constant 0 : index
      %c0_17 = arith.constant 0 : index
      %20 = vector.load %arg7[%c0_16, %c0_17] : memref<10x32xbf16, #tpu.memory_space<vmem>>, vector<10x32xbf16>
      tpu.vector_store %arg7[%c0_16, %c0_17], %19 {strides = array<i32>} : memref<10x32xbf16, #tpu.memory_space<vmem>>, vector<10x32xbf16>,
    } else {
    }
    return
  }
  func.func @transform_0(%arg0: i32, %arg1: i32, %arg2: i32) -> (i32, i32) {
    %c0_i32 = arith.constant 0 : i32
    return %arg0, %arg2 : i32, i32
  }
  func.func @transform_1(%arg0: i32, %arg1: i32, %arg2: i32) -> (i32, i32) {
    %c0_i32 = arith.constant 0 : i32
    return %arg2, %arg1 : i32, i32
  }
  func.func @transform_2(%arg0: i32, %arg1: i32, %arg2: i32) -> (i32, i32) {
    %c0_i32 = arith.constant 0 : i32
    %c0_i32_0 = arith.constant 0 : i32
    return %c0_i32, %arg1 : i32, i32
  }
  func.func @transform_3(%arg0: i32, %arg1: i32, %arg2: i32) -> (i32, i32) {
    %c0_i32 = arith.constant 0 : i32
    return %arg0, %arg1 : i32, i32
  }
  func.func @transform_4(%arg0: i32, %arg1: i32, %arg2: i32) -> (i32, i32) {
    %c0_i32 = arith.constant 0 : i32
    return %arg0, %arg1 : i32, i32
  }
}

module attributes {stable_mosaic.version = 11 : i64} {
  func.func @kernel(%arg0: i32, %arg1: i32, %arg2: i32, %arg3: memref<10x64xbf16, #tpu.memory_space<vmem>>, %arg4: memref<64x32xbf16, #tpu.memory_space<vmem>>, %arg5: memref<1x32xf32, #tpu.memory_space<vmem>>, %arg6: memref<10x32xbf16, #tpu.memory_space<vmem>>, %arg7: memref<10x32xbf16, #tpu.memory_space<vmem>>, %arg8: memref<10x32xf32, #tpu.memory_space<vmem>>) attributes {dimension_semantics = [#tpu.dimension_semantics<parallel>, #tpu.dimension_semantics<parallel>, #tpu.dimension_semantics<arbitrary>], iteration_bounds = array<i64: 1, 1, 1>, scalar_prefetch = 0 : i64, scratch_operands = 1 : i64, tpu.core_type = #tpu.core_type<tc>, window_params = [{transform_indices = @transform_0, window_bounds = array<i64: 10, 64>}, {transform_indices = @transform_1, window_bounds = array<i64: 64, 32>}, {transform_indices = @transform_2, window_bounds = array<i64: 1, 32>}, {transform_indices = @transform_3, window_bounds = array<i64: 10, 32>}, {transform_indices = @transform_4, window_bounds = array<i64: 10, 32>}]} {
    %c0_i32 = arith.constant 0 : i32
    %0 = arith.cmpi eq, %arg2, %c0_i32 : i32
    %1 = arith.extui %0 : i1 to i32
    %c0_i32_0 = arith.constant 0 : i32
    %2 = arith.cmpi ne, %1, %c0_i32_0 : i32
    scf.if %2 {
      %cst_10 = arith.constant 0.000000e+00 : f32
      %12 = vector.broadcast %cst_10 : f32 to vector<10x32xf32>
      %c0_11 = arith.constant 0 : index
      %c0_12 = arith.constant 0 : index
      %13 = vector.load %arg8[%c0_11, %c0_12] : memref<10x32xf32, #tpu.memory_space<vmem>>, vector<10x32xf32>
      tpu.vector_store %arg8[%c0_11, %c0_12], %12 {strides = array<i32>} : memref<10x32xf32, #tpu.memory_space<vmem>>, vector<10x32xf32>,
    } else {
    }
    %c0 = arith.constant 0 : index
    %c0_1 = arith.constant 0 : index
    %3 = vector.load %arg3[%c0, %c0_1] : memref<10x64xbf16, #tpu.memory_space<vmem>>, vector<10x64xbf16>
    %c0_2 = arith.constant 0 : index
    %c0_3 = arith.constant 0 : index
    %4 = vector.load %arg8[%c0_2, %c0_3] : memref<10x32xf32, #tpu.memory_space<vmem>>, vector<10x32xf32>
    %c0_4 = arith.constant 0 : index
    %c0_5 = arith.constant 0 : index
    %5 = vector.load %arg4[%c0_4, %c0_5] : memref<64x32xbf16, #tpu.memory_space<vmem>>, vector<64x32xbf16>
    %cst = arith.constant dense<0.000000e+00> : vector<10x32xf32>
    %6 = tpu.matmul %3, %5, %cst {dimension_numbers = #tpu.dot_dimension_numbers<[1], [0], [0], [1], [0, 0, 1, 1], [], []>} : vector<10x64xbf16>, vector<64x32xbf16>, vector<10x32xf32> -> vector<10x32xf32>
    %7 = arith.addf %4, %6 : vector<10x32xf32>
    %c0_6 = arith.constant 0 : index
    %c0_7 = arith.constant 0 : index
    %8 = vector.load %arg8[%c0_6, %c0_7] : memref<10x32xf32, #tpu.memory_space<vmem>>, vector<10x32xf32>
    tpu.vector_store %arg8[%c0_6, %c0_7], %7 {strides = array<i32>} : memref<10x32xf32, #tpu.memory_space<vmem>>, vector<10x32xf32>,
    %c0_i32_8 = arith.constant 0 : i32
    %9 = arith.cmpi eq, %arg2, %c0_i32_8 : i32
    %10 = arith.extui %9 : i1 to i32
    %c0_i32_9 = arith.constant 0 : i32
    %11 = arith.cmpi ne, %10, %c0_i32_9 : i32
    scf.if %11 {
      %c0_10 = arith.constant 0 : index
      %c0_11 = arith.constant 0 : index
      %12 = vector.load %arg8[%c0_10, %c0_11] : memref<10x32xf32, #tpu.memory_space<vmem>>, vector<10x32xf32>
      %c0_12 = arith.constant 0 : index
      %c0_13 = arith.constant 0 : index
      %13 = vector.load %arg5[%c0_12, %c0_13] : memref<1x32xf32, #tpu.memory_space<vmem>>, vector<1x32xf32>
      %14 = vector.broadcast %13 : vector<1x32xf32> to vector<10x32xf32>
      %15 = arith.addf %12, %14 : vector<10x32xf32>
      %c0_14 = arith.constant 0 : index
      %c0_15 = arith.constant 0 : index
      %16 = vector.load %arg6[%c0_14, %c0_15] : memref<10x32xbf16, #tpu.memory_space<vmem>>, vector<10x32xbf16>
      %17 = arith.extf %16 : vector<10x32xbf16> to vector<10x32xf32>
      %18 = arith.addf %15, %17 : vector<10x32xf32>
      %19 = arith.truncf %18 : vector<10x32xf32> to vector<10x32xbf16>
      %c0_16 = arith.constant 0 : index
      %c0_17 = arith.constant 0 : index
      %20 = vector.load %arg7[%c0_16, %c0_17] : memref<10x32xbf16, #tpu.memory_space<vmem>>, vector<10x32xbf16>
      tpu.vector_store %arg7[%c0_16, %c0_17], %19 {strides = array<i32>} : memref<10x32xbf16, #tpu.memory_space<vmem>>, vector<10x32xbf16>,
    } else {
    }
    return
  }
  func.func @transform_0(%arg0: i32, %arg1: i32, %arg2: i32) -> (i32, i32) {
    %c0_i32 = arith.constant 0 : i32
    return %arg0, %arg2 : i32, i32
  }
  func.func @transform_1(%arg0: i32, %arg1: i32, %arg2: i32) -> (i32, i32) {
    %c0_i32 = arith.constant 0 : i32
    return %arg2, %arg1 : i32, i32
  }
  func.func @transform_2(%arg0: i32, %arg1: i32, %arg2: i32) -> (i32, i32) {
    %c0_i32 = arith.constant 0 : i32
    %c0_i32_0 = arith.constant 0 : i32
    return %c0_i32, %arg1 : i32, i32
  }
  func.func @transform_3(%arg0: i32, %arg1: i32, %arg2: i32) -> (i32, i32) {
    %c0_i32 = arith.constant 0 : i32
    return %arg0, %arg1 : i32, i32
  }
  func.func @transform_4(%arg0: i32, %arg1: i32, %arg2: i32) -> (i32, i32) {
    %c0_i32 = arith.constant 0 : i32
    return %arg0, %arg1 : i32, i32
  }
}

module attributes {stable_mosaic.version = 11 : i64} {
  func.func @_layernorm_kernel(%arg0: i32, %arg1: memref<10x32xbf16, #tpu.memory_space<vmem>>, %arg2: memref<1x32xf32, #tpu.memory_space<vmem>>, %arg3: memref<1x32xf32, #tpu.memory_space<vmem>>, %arg4: memref<10x32xf32, #tpu.memory_space<vmem>>) attributes {dimension_semantics = [#tpu.dimension_semantics<parallel>], iteration_bounds = array<i64: 1>, scalar_prefetch = 0 : i64, scratch_operands = 0 : i64, tpu.core_type = #tpu.core_type<tc>, window_params = [{transform_indices = @transform_0, window_bounds = array<i64: 10, 32>}, {pipeline_mode = #tpu.pipeline_mode<synchronous>, transform_indices = @transform_1, window_bounds = array<i64: 1, 32>}, {pipeline_mode = #tpu.pipeline_mode<synchronous>, transform_indices = @transform_2, window_bounds = array<i64: 1, 32>}, {transform_indices = @transform_3, window_bounds = array<i64: 10, 32>}]} {
    %c0 = arith.constant 0 : index
    %c0_0 = arith.constant 0 : index
    %0 = vector.load %arg1[%c0, %c0_0] : memref<10x32xbf16, #tpu.memory_space<vmem>>, vector<10x32xbf16>
    %1 = arith.extf %0 : vector<10x32xbf16> to vector<10x32xf32>
    %cst = arith.constant dense<0.000000e+00> : vector<10xf32>
    %2 = vector.multi_reduction <add>, %1, %cst [1] : vector<10x32xf32> to vector<10xf32>
    %3 = vector.shape_cast %2 : vector<10xf32> to vector<10x1xf32>
    %cst_1 = arith.constant 3.200000e+01 : f32
    %4 = vector.broadcast %cst_1 : f32 to vector<10x1xf32>
    %5 = arith.divf %3, %4 : vector<10x1xf32>
    %6 = vector.broadcast %5 : vector<10x1xf32> to vector<10x32xf32>
    %7 = arith.subf %1, %6 : vector<10x32xf32>
    %8 = arith.mulf %7, %7 : vector<10x32xf32>
    %cst_2 = arith.constant dense<0.000000e+00> : vector<10xf32>
    %9 = vector.multi_reduction <add>, %8, %cst_2 [1] : vector<10x32xf32> to vector<10xf32>
    %10 = vector.shape_cast %9 : vector<10xf32> to vector<10x1xf32>
    %cst_3 = arith.constant 3.200000e+01 : f32
    %11 = vector.broadcast %cst_3 : f32 to vector<10x1xf32>
    %12 = arith.divf %10, %11 : vector<10x1xf32>
    %13 = vector.broadcast %5 : vector<10x1xf32> to vector<10x32xf32>
    %14 = arith.subf %1, %13 : vector<10x32xf32>
    %cst_4 = arith.constant 9.99999974E-6 : f32
    %15 = vector.broadcast %cst_4 : f32 to vector<10x1xf32>
    %16 = arith.addf %12, %15 : vector<10x1xf32>
    %17 = math.rsqrt %16 : vector<10x1xf32>
    %18 = vector.broadcast %17 : vector<10x1xf32> to vector<10x32xf32>
    %19 = arith.mulf %14, %18 : vector<10x32xf32>
    %c0_5 = arith.constant 0 : index
    %c0_6 = arith.constant 0 : index
    %20 = vector.load %arg2[%c0_5, %c0_6] : memref<1x32xf32, #tpu.memory_space<vmem>>, vector<1x32xf32>
    %21 = vector.broadcast %20 : vector<1x32xf32> to vector<10x32xf32>
    %22 = arith.mulf %19, %21 : vector<10x32xf32>
    %c0_7 = arith.constant 0 : index
    %c0_8 = arith.constant 0 : index
    %23 = vector.load %arg3[%c0_7, %c0_8] : memref<1x32xf32, #tpu.memory_space<vmem>>, vector<1x32xf32>
    %24 = vector.broadcast %23 : vector<1x32xf32> to vector<10x32xf32>
    %25 = arith.addf %22, %24 : vector<10x32xf32>
    %c0_9 = arith.constant 0 : index
    %c0_10 = arith.constant 0 : index
    %26 = vector.load %arg4[%c0_9, %c0_10] : memref<10x32xf32, #tpu.memory_space<vmem>>, vector<10x32xf32>
    tpu.vector_store %arg4[%c0_9, %c0_10], %25 {strides = array<i32>} : memref<10x32xf32, #tpu.memory_space<vmem>>, vector<10x32xf32>,
    return
  }
  func.func @transform_0(%arg0: i32) -> (i32, i32) {
    %c0_i32 = arith.constant 0 : i32
    %c0_i32_0 = arith.constant 0 : i32
    return %arg0, %c0_i32 : i32, i32
  }
  func.func @transform_1(%arg0: i32) -> (i32, i32) {
    %c0_i32 = arith.constant 0 : i32
    %c0_i32_0 = arith.constant 0 : i32
    %c0_i32_1 = arith.constant 0 : i32
    return %c0_i32, %c0_i32_0 : i32, i32
  }
  func.func @transform_2(%arg0: i32) -> (i32, i32) {
    %c0_i32 = arith.constant 0 : i32
    %c0_i32_0 = arith.constant 0 : i32
    %c0_i32_1 = arith.constant 0 : i32
    return %c0_i32, %c0_i32_0 : i32, i32
  }
  func.func @transform_3(%arg0: i32) -> (i32, i32) {
    %c0_i32 = arith.constant 0 : i32
    %c0_i32_0 = arith.constant 0 : i32
    return %arg0, %c0_i32 : i32, i32
  }
}

</mosaic_0001>

<bundles_post_ra>
// kernel: vit_forward.15
= control target key start
LH: loop header
LB: loop body
LE: loop exit
PB: predicated region body
PF: predicated region fallthrough
CT: control target
= control target key end

     0   :  { %vm16_vm0 = vcmask 261120   ;;  %vm48_vm1 = vcmask 257024   ;;  %s90_s0 = inlined_call_operand.vmem [shape: bf16[8,32], index: 0, kind: input, shape index: {}]   ;;  %s91_s1 = inlined_call_operand.vmem [shape: f32[1,32], index: 1, kind: input, shape index: {}]   ;;  %s92_s2 = inlined_call_operand.vmem [shape: f32[1,32], index: 2, kind: input, shape index: {}]   ;;  %s93_s3 = inlined_call_operand.vmem [shape: bf16[8,32], index: 3, kind: output, shape index: {}]  }
   0x1   :  { %v14_v0 = vld [vmem:[%s90_s0] sm:$0xf] }
   0x2   :  { %v15_v1 = vunpack.c.l.bf16 %v14_v0  ;;  %v54_v12 = vld [vmem:[%s91_s1] ss:$0 sm:$0xff] }
   0x3   :  { %v55_v14 = vld [vmem:[%s92_s2] ss:$0 sm:$0xff] }
   0x4   :  { %v17_v2 = vsel %vm16_vm0, %v15_v1, 0.0 }
   0x5   :  { %18 = vadd.xlane.f32.xlu0 %v17_v2 }
  0x8e   :  { %v19_v3 = vpop.xlane.xlu0 %18 }
  0x8f   :  { %v21_v4 = vmul.f32 0.03125, %v19_v3 }
  0x91   :  { %v22_v5 = vsub.f32 %v15_v1, %v21_v4 }
  0x93   :  { %v23_v6 = vmul.f32 %v22_v5, %v22_v5 }
  0x95   :  { %v24_v7 = vsel %vm16_vm0, %v23_v6, 0.0 }
  0x96   :  { %25 = vadd.xlane.f32.xlu0 %v24_v7 }
 0x11f   :  { %v26_v8 = vpop.xlane.xlu0 %25 }
 0x120   :  { %v27_v9 = vmul.f32 0.03125, %v26_v8 }
 0x122   :  { %v28_v10 = vadd.f32 1e-05, %v27_v9 }
 0x124   :  { %56 = vrsqrt.f32 %v28_v10 }
 0x131   :  { %v57_v11 = vpop.eup %56 }
 0x132   :  { %v30_v13 = vmul.f32 %v57_v11, %v22_v5 }
 0x134   :  { %v38_v15 = vmul.f32 %v54_v12, %v30_v13 }
 0x136   :  { %v46_v16 = vadd.f32 %v55_v14, %v38_v15 }
 0x138   :  { %v47_v17 = vpack.c.bf16 %v46_v16, %v46_v16 }
 0x13a   :  { %49 = vst.msk [vmem:[%s93_s3] sm:$0xf] %vm48_vm1, %v47_v17 }

// kernel: vit_forward.16
= control target key start
LH: loop header
LB: loop body
LE: loop exit
PB: predicated region body
PF: predicated region fallthrough
CT: control target
= control target key end

     0   :  { %s224_s9 = smov 0   ;;  %s252_s0 = inlined_call_operand.vmem [shape: bf16[2,5,32], index: 0, kind: input, shape index: {}]   ;;  %s253_s1 = inlined_call_operand.vmem [shape: f32[5,32], index: 1, kind: input, shape index: {}]   ;;  %s254_s2 = inlined_call_operand.vmem [shape: bf16[2,5,32], index: 2, kind: output, shape index: {}]  }
   0x1 LB: > { %s203_s10 = sadd.s32 4294967295, %s226_s9   ;;  %p207_p0 = scmp.ge.s32.totalorder %s226_s9, 1  ;;  %s226_s9 = sphi %s224_s9, %s12_s9  }
   0x2   : > { %p111_p1 = scmp.lt.s32.totalorder %s226_s9, 3 }
   0x4   : > { %p112_p2 = pnand %p207_p0, %p111_p1 }
   0x5   : > { %p131_p3 = scmp.lt.s32.totalorder (!%p112_p2), %s203_s10, 1 }
   0x6   : > { %115 = sbr.rel (%p112_p2) target bundleno = 23 (0x17), region = 28 }
   0xb   : > { %s256_s10 = smov (!%p131_p3, %s203_s10), 1  ;;  %v141_v1 = vld [vmem:[%s253_s1] sm:$0x1f]  ;;  %vm144_vm0 = vcmask 256000   ;;  %vm145_vm1 = vsmask.f32 2304 }
   0xc   : > { %s208_s11 = sshll.u32 %s256_s10, 2  ;;  %vm146_vm2 = vmand %vm144_vm0, %vm145_vm1 }
   0xd   : > { %s134_s14 = scalar_lea.vmem %s252_s0, %s208_s11  ;;  %s138_s19 = scalar_lea.vmem %s254_s2, %s208_s11 }
   0xe   : > { %v139_v0 = vld [vmem:[%s134_s14] sm:$0x7] }
   0xf   : > { %v140_v2 = vunpack.c.l.bf16 %v139_v0  ;;  %v147_v4 = vld [vmem:[%s138_s19] sm:$0x7] }
  0x11   : > { %v142_v3 = vadd.f32 %v141_v1, %v140_v2 }
  0x13   : > { %v143_v5 = vpack.c.bf16 %v142_v3, %v142_v3 }
  0x15   : > { %v148_v6 = vsel %vm146_vm2, %v143_v5, %v147_v4 }
  0x16   : > { %149 = vst [vmem:[%s138_s19] sm:$0x7] %v148_v6 }
  0x17 PF: > { %s12_s9 = sadd.s32 1, %s226_s9  }
  0x18   : > { %p9_p4 = scmp.ge.s32.totalorder %s12_s9, 4  }
  0x1a   :  { %11 = sbr.rel (!%p9_p4) target bundleno = 1 (0x1), region = 58 }

// kernel: vit_forward.17
= control target key start
LH: loop header
LB: loop body
LE: loop exit
PB: predicated region body
PF: predicated region fallthrough
CT: control target
= control target key end

     0   :  { %vm34_vm0 = vcmask 261120   ;;  %vm38_vm1 = vcmask 254976   ;;  %v224_v17 = vmov 0.0   ;;  %vm225_vm2 = vmmov 0   ;;  %s280_s0 = inlined_call_operand.vmem [shape: bf16[10,32], index: 0, kind: input, shape index: {}]   ;;  %s281_s1 = inlined_call_operand.vmem [shape: bf16[32,96], index: 1, kind: input, shape index: {}]   ;;  %s282_s2 = inlined_call_operand.vmem [shape: f32[1,32], index: 2, kind: input, shape index: {}]   ;;  %s283_s3 = inlined_call_operand.vmem [shape: f32[1,32], index: 3, kind: input, shape index: {}]   ;;  %s284_s4 = inlined_call_operand.vmem [shape: bf16[10,96], index: 4, kind: output, shape index: {}]  }
   0x1   :  { %v30_v0 = vld [vmem:[%s280_s0] sm:$0xf]  ;;  %v31_v1 = vld [vmem:[%s280_s0 + $0x4] sm:$0x1]  ;;  %v217_v16 = vld [vmem:[%s281_s1 + $0x8] sm:$0xff]   ;;  %207 = vmatprep.subr.bf16.mxu0 %v224_v17  ;;  %211 = vmatprep.mubr.msk.bf16.mxu0 %vm225_vm2, %v224_v17  ;;  %vm22_vm3 = vcmask 785408  }
   0x2   :  { %v32_v2 = vunpack.c.l.bf16 %v30_v0  ;;  %v33_v3 = vunpack.c.l.bf16 %v31_v1  ;;  %208 = vmatpush3.bf16.msra.mxu0 %v217_v16  ;;  %v218_v18 = vld [vmem:[%s281_s1] sm:$0xff]   ;;  %23 = vst.msk [vmem:[#allocation2] sm:$0xff] %vm22_vm3, %v224_v17  ;;  %vm89_vm4 = vcmask 257024   ;;  %vm91_vm5 = vcmask 253952  }
   0x3   :  { %209 = vmatprep.subr.bf16.mxu0 %v224_v17  ;;  %v190_v26 = vld [vmem:[%s282_s2] ss:$0 sm:$0xff]  ;;  %vm24_vm6 = vcmask 779264   ;;  %vm182_vm7 = vcmask 781312   ;;  %vm184_vm8 = vcmask 778240  }
   0x4   :  { %v35_v4 = vsel %vm34_vm0, %v32_v2, 0.0  ;;  %v39_v5 = vsel %vm38_vm1, %v33_v3, 0.0  ;;  %v191_v28 = vld [vmem:[%s283_s3] ss:$0 sm:$0xff]  ;;  %25 = vst.msk [vmem:[#allocation2 + $0x8] sm:$0x3] %vm24_vm6, %v224_v17 }
   0x5   :  { %36 = vadd.xlane.f32.xlu0 %v35_v4 }
   0x6   :  { %210 = vmatpush3.bf16.msra.mxu0 %v218_v18 }
   0x9   :  { %40 = vadd.xlane.f32.xlu0 %v39_v5  ;;  %v95_v38 = vld [vmem:[#allocation2] sm:$0xff] }
   0xb   :  { %v96_v42 = vld [vmem:[#allocation2 + $0x8] sm:$0x3] }
  0x8e   :  { %v37_v6 = vpop.xlane.xlu0 %36 }
  0x8f   :  { %v43_v7 = vmul.f32 0.03125, %v37_v6 }
  0x91   :  { %v45_v8 = vsub.f32 %v32_v2, %v43_v7 }
  0x92   :  { %v41_v9 = vpop.xlane.xlu0 %40 }
  0x93   :  { %v44_v10 = vmul.f32 0.03125, %v41_v9  ;;  %v47_v11 = vmul.f32 %v45_v8, %v45_v8 }
  0x95   :  { %v46_v12 = vsub.f32 %v33_v3, %v44_v10  ;;  %v49_v13 = vsel %vm34_vm0, %v47_v11, 0.0 }
  0x96   :  { %50 = vadd.xlane.f32.xlu1 %v49_v13 }
  0x97   :  { %v48_v14 = vmul.f32 %v46_v12, %v46_v12 }
  0x99   :  { %v52_v15 = vsel %vm38_vm1, %v48_v14, 0.0 }
  0x9a   :  { %53 = vadd.xlane.f32.xlu1 %v52_v15 }
 0x11f   :  { %v51_v19 = vpop.xlane.xlu1 %50 }
 0x120   :  { %v55_v20 = vmul.f32 0.03125, %v51_v19 }
 0x122   :  { %v57_v21 = vadd.f32 1e-05, %v55_v20 }
 0x123   :  { %v54_v22 = vpop.xlane.xlu1 %53 }
 0x124   :  { %220 = vrsqrt.f32 %v57_v21  ;;  %v56_v23 = vmul.f32 0.03125, %v54_v22 }
 0x126   :  { %v58_v24 = vadd.f32 1e-05, %v56_v23 }
 0x128   :  { %222 = vrsqrt.f32 %v58_v24 }
 0x131   :  { %v221_v25 = vpop.eup %220 }
 0x132   :  { %v61_v27 = vmul.f32 %v221_v25, %v45_v8 }
 0x134   :  { %v70_v29 = vmul.f32 %v190_v26, %v61_v27 }
 0x135   :  { %v223_v30 = vpop.eup %222 }
 0x136   :  { %v79_v31 = vadd.f32 %v191_v28, %v70_v29  ;;  %v62_v32 = vmul.f32 %v223_v30, %v46_v12 }
 0x138   :  { %v200_v33 = vpack.c.bf16 %v79_v31, %v79_v31  ;;  %v71_v34 = vmul.f32 %v190_v26, %v62_v32 }
 0x13a   :  { %90 = vst.msk [vmem:[#allocation3] sm:$0xf] %vm89_vm4, %v200_v33  ;;  %v80_v35 = vadd.f32 %v191_v28, %v71_v34 }
 0x13c   :  { %v201_v36 = vpack.c.bf16 %v80_v35, %v80_v35 }
 0x13e   :  { %92 = vst.msk [vmem:[#allocation3 + $0x4] sm:$0x1] %vm91_vm5, %v201_v36 }
 0x145   :  { %v219_v37 = vld [vmem:[#allocation3] sm:$0x1f]  }
 0x146   :  { %212 = vmatmul.mubr.msk.bf16.vlgmr.msra.gmra.mxu0 %vm34_vm0, %v219_v37 }
 0x206   :  { %v156_v39 = vpop.f32.mrf.mxu0 }
 0x207   :  { %v163_v40 = vadd.f32 %v156_v39, %v95_v38 }
 0x208   :  { %v213_v41 = vpop.f32.mrf.mxu0 }
 0x209   :  { %166 = vst.msk [vmem:[#allocation2] sm:$0xff] %vm22_vm3, %v163_v40 }
 0x20a   :  { %v159_v43 = vpop.f32.mrf.mxu0 }
 0x20b   :  { %v164_v44 = vadd.f32 %v159_v43, %v96_v42 }
 0x20c   :  { %v214_v45 = vpop.f32.mrf.mxu0 }
 0x20d   :  { %168 = vst.msk [vmem:[#allocation2 + $0x8] sm:$0x3] %vm24_vm6, %v164_v44 }
 0x210   :  { %v172_v46 = vld [vmem:[#allocation2] sm:$0xff] }
 0x211   :  { %v202_v47 = vpack.c.bf16 %v172_v46, %v172_v46 }
 0x213   :  { %183 = vst.msk [vmem:[%s284_s4] sm:$0xf] %vm182_vm7, %v202_v47 }
 0x214   :  { %v173_v48 = vld [vmem:[#allocation2 + $0x8] sm:$0x3] }
 0x215   :  { %v203_v49 = vpack.c.bf16 %v173_v48, %v173_v48 }
 0x217   :  { %185 = vst.msk [vmem:[%s284_s4 + $0x4] sm:$0x1] %vm184_vm8, %v203_v49 }

// kernel: vit_forward.14
= control target key start
LH: loop header
LB: loop body
LE: loop exit
PB: predicated region body
PF: predicated region fallthrough
CT: control target
= control target key end

     0   :  { %v52_v29 = vlaneseq  ;;  %vm25_vm0 = vcmask 261120   ;;  %v350_v48 = vmov 0.0   ;;  %vm280_vm1 = vcmask 257024   ;;  %s447_s0 = inlined_call_operand.vmem [shape: f32[8,256], index: 0, kind: input, shape index: {}]   ;;  %s448_s1 = inlined_call_operand.vmem [shape: bf16[256,32], index: 1, kind: input, shape index: {}]   ;;  %s449_s2 = inlined_call_operand.vmem [shape: f32[1,256], index: 2, kind: input, shape index: {}]   ;;  %s450_s3 = inlined_call_operand.vmem [shape: f32[1,256], index: 3, kind: input, shape index: {}]   ;;  %s451_s4 = inlined_call_operand.vmem [shape: f32[1,32], index: 4, kind: input, shape index: {}]   ;;  %s452_s5 = inlined_call_operand.vmem [shape: bf16[8,32], index: 5, kind: output, shape index: {}]  }
   0x1   :  { %v31_v0 = vld [vmem:[%s447_s0] sm:$0xff]  ;;  %v32_v1 = vld [vmem:[%s447_s0 + $0x8] sm:$0xff]  ;;  %v332_v3 = vld [vmem:[%s448_s1 + $0x78] sm:$0xff]   ;;  %26 = vst.msk [vmem:[#allocation2] sm:$0xff] %vm25_vm0, %v350_v48 }
   0x2   :  { %v33_v2 = vadd.f32 %v32_v1, %v31_v0  ;;  %v333_v4 = vld [vmem:[%s448_s1 + $0x38] sm:$0xff]   ;;  %309 = vmatprep.subr.bf16.mxu0 %v332_v3  ;;  %v334_v5 = vld [vmem:[%s448_s1 + $0x70] sm:$0xff]   ;;  %v336_v14 = vld [vmem:[%s448_s1 + $0x68] sm:$0xff]   ;;  %v53_v30 = vshrl.u32 %v52_v29, 7 }
   0x3   :  { %310 = vmatpush3.bf16.msra.mxu0 %v333_v4  ;;  %v335_v13 = vld [vmem:[%s448_s1 + $0x30] sm:$0xff]   ;;  %v337_v15 = vld [vmem:[%s448_s1 + $0x28] sm:$0xff]   ;;  %v338_v16 = vld [vmem:[%s448_s1 + $0x60] sm:$0xff]  }
   0x4   :  { %34 = vadd.xlane.f32.xlu0 %v33_v2  ;;  %311 = vmatprep.subr.bf16.mxu0 %v334_v5  ;;  %v339_v17 = vld [vmem:[%s448_s1 + $0x20] sm:$0xff]   ;;  %v340_v18 = vld [vmem:[%s448_s1 + $0x58] sm:$0xff]   ;;  %v342_v20 = vld [vmem:[%s448_s1 + $0x50] sm:$0xff]   ;;  %v54_v31 = vsub.s32 0, %v53_v30  ;;  %v58_v32 = vsub.s32 1, %v53_v30 }
   0x5   :  { %v341_v19 = vld [vmem:[%s448_s1 + $0x18] sm:$0xff]   ;;  %v343_v21 = vld [vmem:[%s448_s1 + $0x10] sm:$0xff]   ;;  %v344_v22 = vld [vmem:[%s448_s1 + $0x48] sm:$0xff]  }
   0x6   :  { %v345_v23 = vld [vmem:[%s448_s1 + $0x8] sm:$0xff]   ;;  %v346_v24 = vld [vmem:[%s448_s1 + $0x40] sm:$0xff]  }
   0x7   :  { %312 = vmatpush3.bf16.msra.mxu0 %v335_v13  ;;  %v347_v25 = vld [vmem:[%s448_s1] sm:$0xff]  }
   0x8   :  { %313 = vmatprep.subr.bf16.mxu0 %v336_v14  ;;  %v50_v33 = vld [vmem:[%s449_s2] sm:$0x3] }
   0x9   :  { %v64_v34 = vld [vmem:[%s450_s3] sm:$0x3]  ;;  %v55_v35 = vrot.slane %v50_v33, %v54_v31  ;;  %v59_v36 = vrot.slane %v50_v33, %v58_v32 }
   0xa   :  { %v69_v39 = vrot.slane %v64_v34, %v54_v31  ;;  %v73_v40 = vrot.slane %v64_v34, %v58_v32  ;;  %v88_v50 = vld [vmem:[#allocation2] sm:$0xff] }
   0xb   :  { %314 = vmatpush3.bf16.msra.mxu0 %v337_v15  ;;  %v305_v56 = vld [vmem:[%s451_s4] ss:$0 sm:$0xff] }
   0xc   :  { %315 = vmatprep.subr.bf16.mxu0 %v338_v16 }
   0xf   :  { %316 = vmatpush3.bf16.msra.mxu0 %v339_v17 }
  0x10   :  { %317 = vmatprep.subr.bf16.mxu0 %v340_v18 }
  0x13   :  { %318 = vmatpush3.bf16.msra.mxu0 %v341_v19 }
  0x14   :  { %319 = vmatprep.subr.bf16.mxu0 %v342_v20 }
  0x17   :  { %320 = vmatpush3.bf16.msra.mxu0 %v343_v21 }
  0x18   :  { %321 = vmatprep.subr.bf16.mxu0 %v344_v22 }
  0x1b   :  { %322 = vmatpush3.bf16.msra.mxu0 %v345_v23 }
  0x1c   :  { %323 = vmatprep.subr.bf16.mxu0 %v346_v24 }
  0x1f   :  { %324 = vmatpush3.bf16.msra.mxu0 %v347_v25 }
  0x8d   :  { %v35_v6 = vpop.xlane.xlu0 %34 }
  0x8e   :  { %v37_v7 = vmul.f32 0.00390625, %v35_v6 }
  0x90   :  { %v38_v8 = vsub.f32 %v31_v0, %v37_v7  ;;  %v39_v9 = vsub.f32 %v32_v1, %v37_v7 }
  0x92   :  { %v40_v10 = vmul.f32 %v38_v8, %v38_v8  ;;  %v41_v11 = vmul.f32 %v39_v9, %v39_v9 }
  0x94   :  { %v42_v12 = vadd.f32 %v41_v11, %v40_v10 }
  0x96   :  { %43 = vadd.xlane.f32.xlu0 %v42_v12 }
 0x11f   :  { %v44_v26 = vpop.xlane.xlu0 %43 }
 0x120   :  { %v45_v27 = vmul.f32 0.00390625, %v44_v26 }
 0x122   :  { %v46_v28 = vadd.f32 1e-05, %v45_v27 }
 0x124   :  { %348 = vrsqrt.f32 %v46_v28 }
 0x131   :  { %v349_v37 = vpop.eup %348 }
 0x132   :  { %v49_v38 = vmul.f32 %v349_v37, %v39_v9  ;;  %v48_v41 = vmul.f32 %v349_v37, %v38_v8 }
 0x134   :  { %v63_v42 = vmul.f32 %v59_v36, %v49_v38  ;;  %v62_v43 = vmul.f32 %v55_v35, %v48_v41 }
 0x136   :  { %v77_v44 = vadd.f32 %v73_v40, %v63_v42  ;;  %v76_v45 = vadd.f32 %v69_v39, %v62_v43 }
 0x138   :  { %v308_v46 = vpack.c.bf16 %v77_v44, %v77_v44  ;;  %v307_v47 = vpack.c.bf16 %v76_v45, %v76_v45 }
 0x13a   :  { %256 = vmatprep.mubr.bf16.mxu0 %v308_v46 }
 0x13b   :  { %257 = vmatmul.mubr.bf16.vlgmr.msra.gmra.mxu0 %v307_v47 }
 0x1fb   :  { %v325_v49 = vpop.f32.mrf.mxu0 }
 0x1fd   :  { %v326_v51 = vpop.f32.mrf.mxu0 }
 0x1fe   :  { %v327_v52 = vadd.f32 %v326_v51, %v325_v49 }
 0x1ff   :  { %v328_v53 = vpop.f32.mrf.mxu0 }
 0x200   :  { %v264_v54 = vadd.f32 %v327_v52, %v88_v50 }
 0x201   :  { %v329_v55 = vpop.f32.mrf.mxu0 }
 0x202   :  { %266 = vst.msk [vmem:[#allocation2] sm:$0xff] %vm25_vm0, %v264_v54 }
 0x209   :  { %v270_v57 = vld [vmem:[#allocation2] sm:$0xff] }
 0x20a   :  { %v278_v58 = vadd.f32 %v305_v56, %v270_v57 }
 0x20c   :  { %v279_v59 = vpack.c.bf16 %v278_v58, %v278_v58 }
 0x20e   :  { %281 = vst.msk [vmem:[%s452_s5] sm:$0xf] %vm280_vm1, %v279_v59 }

// kernel: vit_forward.18
= control target key start
LH: loop header
LB: loop body
LE: loop exit
PB: predicated region body
PF: predicated region fallthrough
CT: control target
= control target key end

     0   :  { %s621_s6 = smov 0   ;;  %s623_s7 = smov 0   ;;  %s674_s0 = inlined_call_operand.vmem [shape: bf16[2,5,96], index: 0, kind: input, shape index: {}]   ;;  %s675_s1 = inlined_call_operand.vmem [shape: bf16[2,5,32], index: 1, kind: output, shape index: {}]  }
   0x1   :  { %s625_s8 = smov 0  }
   0x2 LB: > { %s23_s9 = sadd.s32 1, %s598_s7  ;;  %p496_p0 = scmp.ge.s32.totalorder %s602_s8, 1  ;;  %s602_s8 = sphi %s625_s8, %s11_s8   ;;  %s598_s7 = sphi %s623_s7, %s677_s7   ;;  %s594_s6 = sphi %s621_s6, %s676_s6  }
   0x3   : > { %p25_p1 = scmp.ge.s32.totalorder %s23_s9, 2  ;;  %p105_p2 = scmp.lt.s32.totalorder %s602_s8, 3 }
   0x5   : > { %s679_s9 = smov (%p25_p1, %s23_s9), 0  ;;  %p106_p3 = pnand %p496_p0, %p105_p2 }
   0x6   : > { %p129_p4 = scmp.lt.s32.totalorder (!%p106_p3), %s594_s6, 1  ;;  %s604_s14 = smov (!%p106_p3), 112  }
   0x7   : > { %109 = sbr.rel (%p106_p3) target bundleno = 1017 (0x3f9), region = 24  ;;  %s605_s15 = smov (!%p106_p3), 96  }
   0x8   : > { %s608_s16 = smov (!%p106_p3), 64   ;;  %s610_s17 = smov (!%p106_p3), 16  }
   0xc   : > { %s681_s6 = smov (!%p129_p4, %s594_s6), 1  ;;  %v606_v2 = vmov 0.0   ;;  %vm607_vm0 = vmmov 0   ;;  %vm190_vm1 = vcmask 130048   ;;  %vm304_vm2 = vcmask 1041408  }
   0xd   : > { %s497_s10 = sshll.u32 %s681_s6, 2  ;;  %515 = vmatprep.subr.bf16.mxu0 %v606_v2  ;;  %521 = vmatprep.subr.bf16.mxu1 %v606_v2  ;;  %vm305_vm3 = vcmask 1042432   ;;  %v609_v9 = vmov 65535   ;;  %vm277_vm4 = vcmask 36864   ;;  %vm300_vm5 = vcmask 39936  }
   0xe   : > { %s135_s13 = scalar_lea.vmem %s674_s0, %s497_s10  ;;  %517 = vmatprep.mubr.msk.bf16.mxu0 %vm607_vm0, %v606_v2  ;;  %523 = vmatprep.mubr.msk.bf16.mxu1 %vm607_vm0, %v606_v2  ;;  %v306_v10 = vsel %vm304_vm2, 4294967295, %v609_v9  ;;  %s142_s20 = scalar_lea.vmem %s675_s1, %s497_s10  ;;  %vm412_vm6 = vcmask 256000   ;;  %vm413_vm7 = vsmask.f32 2304 }
   0xf   : > { %v144_v0 = vld [vmem:[%s135_s13] sm:$0x7]  ;;  %v307_v11 = vsel %vm305_vm3, %v306_v10, 0  ;;  %vm414_vm8 = vmand %vm412_vm6, %vm413_vm7 }
  0x10   : > { %146 = vrot.lane.b32.xlu0 %v144_v0, %s604_s14  ;;  %v499_v1 = vcombine.low %v144_v0, %v144_v0  ;;  %v415_v53 = vld [vmem:[%s142_s20] sm:$0x7] }
  0x12   : > { %152 = vrot.lane.b32.xlu1 %v499_v1, %s605_s15 }
  0x82   : > { %v147_v3 = vpop.permute.xlu0 %146 }
  0x83   : > { %v500_v4 = vcombine.low %v147_v3, %v147_v3 }
  0x84   : > { %v153_v5 = vpop.permute.xlu1 %152 }
  0x85   : > { %154 = vrot.lane.b32.xlu0 %v500_v4, %s605_s15 }
  0xa3   : > { %158 = vxpose.xlu0.c.b16.start.end [1/1] (short) (narrow) %v153_v5, 16 }
  0xf7   : > { %v155_v6 = vpop.permute.xlu0 %154 }
  0xf8   : > { %174 = vxpose.xlu1.c.b16.start.end [1/1] (short) (narrow) %v155_v6, 16 }
  0xfc   : > { %351 = vrot.lane.b32.xlu1 %v500_v4, %s608_s16 }
 0x105   : > { %v166_v7 = vpop.trf.xlu0 }
 0x106   : > { %516 = vmatpush3.bf16.msra.mxu0 %v166_v7 }
 0x107   : > { %527 = vmatprep.subr.bf16.mxu0 %v606_v2 }
 0x109   : > { %518 = vmatmul.mubr.msk.bf16.vlgmr.msra.gmra.mxu0 %vm190_vm1, %v144_v0 }
 0x10a   : > { %529 = vmatprep.mubr.msk.bf16.mxu0 %vm607_vm0, %v606_v2 }
 0x15a   : > { %v182_v8 = vpop.trf.xlu1 }
 0x15b   : > { %522 = vmatpush3.bf16.msra.mxu1 %v182_v8 }
 0x15c   : > { %533 = vmatprep.subr.bf16.mxu1 %v606_v2 }
 0x15e   : > { %524 = vmatmul.mubr.msk.bf16.vlgmr.msra.gmra.mxu1 %vm190_vm1, %v147_v3 }
 0x15f   : > { %535 = vmatprep.mubr.msk.bf16.mxu1 %vm607_vm0, %v606_v2 }
 0x16e   : > { %v352_v12 = vpop.permute.xlu1 %351 }
 0x16f   : > { %v357_v13 = vand.u32 %v352_v12, %v307_v11 }
 0x171   : > { %534 = vmatpush3.bf16.msra.mxu1 %v357_v13 }
 0x1c9   : > { %v228_v14 = vpop.f32.mrf.mxu0 }
 0x1ca   : > { %v278_v15 = vsel %vm277_vm4, %v228_v14, -inf }
 0x1cb   : > { %279 = vmax.xlane.f32.xlu1 %v278_v15  ;;  %v519_v16 = vpop.f32.mrf.mxu0 }
 0x1cd   : > { %v231_v17 = vpop.f32.mrf.mxu0 }
 0x1cf   : > { %v520_v18 = vpop.f32.mrf.mxu0 }
 0x21e   : > { %v271_v19 = vpop.f32.mrf.mxu1 }
 0x21f   : > { %v281_v20 = vsel %vm277_vm4, %v271_v19, -inf }
 0x220   : > { %282 = vmax.xlane.f32.xlu0 %v281_v20  ;;  %v525_v21 = vpop.f32.mrf.mxu1 }
 0x222   : > { %v274_v22 = vpop.f32.mrf.mxu1 }
 0x224   : > { %v526_v23 = vpop.f32.mrf.mxu1 }
 0x236   : > { %298 = vrot.lane.b32.xlu0 %v499_v1, %s608_s16 }
 0x254   : > { %v280_v24 = vpop.xlane.xlu1 %279 }
 0x255   : > { %v284_v25 = vsub.f32 %v228_v14, %v280_v24 }
 0x257   : > { %v286_v26 = vmul.f32 1.442695, %v284_v25 }
 0x259   : > { %572 = vpow2.f32 %v286_v26 }
 0x266   : > { %v573_v27 = vpop.eup %572 }
 0x267   : > { %v290_v28 = vsel %vm277_vm4, %v573_v27, 0.0  ;;  %v296_v34 = vpack.c.bf16 %v573_v27, %v573_v27 }
 0x268   : > { %291 = vadd.xlane.f32.xlu1 %v290_v28 }
 0x2a9   : > { %v283_v29 = vpop.xlane.xlu0 %282 }
 0x2aa   : > { %v285_v30 = vsub.f32 %v271_v19, %v283_v29 }
 0x2ac   : > { %v288_v31 = vmul.f32 1.442695, %v285_v30 }
 0x2ad   : > { %v299_v32 = vpop.permute.xlu0 %298 }
 0x2ae   : > { %574 = vpow2.f32 %v288_v31  ;;  %v309_v33 = vand.u32 %v307_v11, %v299_v32 }
 0x2b0   : > { %528 = vmatpush3.bf16.msra.mxu0 %v309_v33 }
 0x2b3   : > { %530 = vmatmul.mubr.msk.bf16.vlgmr.msra.gmra.mxu0 %vm300_vm5, %v296_v34 }
 0x2bb   : > { %v575_v35 = vpop.eup %574 }
 0x2bc   : > { %v293_v36 = vsel %vm277_vm4, %v575_v35, 0.0  ;;  %v297_v37 = vpack.c.bf16 %v575_v35, %v575_v35 }
 0x2bd   : > { %294 = vadd.xlane.f32.xlu0 %v293_v36 }
 0x2be   : > { %536 = vmatmul.mubr.msk.bf16.vlgmr.msra.gmra.mxu1 %vm300_vm5, %v297_v37 }
 0x2f1   : > { %v292_v50 = vpop.xlane.xlu1 %291 }
 0x346   : > { %v295_v38 = vpop.xlane.xlu0 %294 }
 0x347   : > { %576 = vrcp.f32 %v295_v38 }
 0x348   : > { %578 = vrcp.f32 %v292_v50 }
 0x354   : > { %v577_v43 = vpop.eup %576 }
 0x355   : > { %v579_v51 = vpop.eup %578 }
 0x373   : > { %v345_v39 = vpop.f32.mrf.mxu0 }
 0x374   : > { %v401_v52 = vmul.f32 %v579_v51, %v345_v39 }
 0x375   : > { %v531_v40 = vpop.f32.mrf.mxu0 }
 0x376   : > { %v403_v54 = vpack.c.bf16 %v401_v52, %v401_v52 }
 0x377   : > { %v348_v41 = vpop.f32.mrf.mxu0 }
 0x379   : > { %v532_v42 = vpop.f32.mrf.mxu0 }
 0x37e   : > { %v393_v44 = vpop.f32.mrf.mxu1 }
 0x37f   : > { %v402_v45 = vmul.f32 %v577_v43, %v393_v44 }
 0x380   : > { %v537_v46 = vpop.f32.mrf.mxu1 }
 0x381   : > { %v404_v47 = vpack.c.bf16 %v402_v45, %v402_v45 }
 0x382   : > { %v396_v48 = vpop.f32.mrf.mxu1 }
 0x383   : > { %406 = vrot.lane.b32.xlu1 %v404_v47, %s610_s17 }
 0x384   : > { %v538_v49 = vpop.f32.mrf.mxu1 }
 0x3f5   : > { %v407_v55 = vpop.permute.xlu1 %406 }
 0x3f6   : > { %v410_v56 = vsel %vm190_vm1, %v403_v54, %v407_v55 }
 0x3f7   : > { %v416_v57 = vsel %vm414_vm8, %v410_v56, %v415_v53 }
 0x3f8   : > { %417 = vst [vmem:[%s142_s20] sm:$0x7] %v416_v57 }
 0x3f9 PF: > { %s11_s8 = sadd.s32 1, %s602_s8   ;;  %s676_s6 = smov %s598_s7 }
 0x3fa   : > { %p8_p5 = scmp.ge.s32.totalorder %s11_s8, 4   ;;  %s677_s7 = smov %s679_s9 }
 0x3fc   :  { %10 = sbr.rel (!%p8_p5) target bundleno = 2 (0x2), region = 54 }

// kernel: vit_forward.19
= control target key start
LH: loop header
LB: loop body
LE: loop exit
PB: predicated region body
PF: predicated region fallthrough
CT: control target
= control target key end

     0   :  { %vm22_vm0 = vcmask 261120   ;;  %v162_v0 = vmov 0.0   ;;  %vm163_vm1 = vmmov 0   ;;  %vm24_vm2 = vcmask 254976   ;;  %s216_s1 = inlined_call_operand.vmem [shape: bf16[32,32], index: 1, kind: input, shape index: {}]   ;;  %s217_s0 = inlined_call_operand.vmem [shape: bf16[10,32], index: 0, kind: input, shape index: {}]   ;;  %s218_s3 = inlined_call_operand.vmem [shape: bf16[10,32], index: 3, kind: input, shape index: {}]   ;;  %s219_s2 = inlined_call_operand.vmem [shape: f32[1,32], index: 2, kind: input, shape index: {}]   ;;  %s220_s4 = inlined_call_operand.vmem [shape: bf16[10,32], index: 4, kind: output, shape index: {}]  }
   0x1   :  { %149 = vmatprep.subr.bf16.mxu0 %v162_v0  ;;  %v159_v1 = vld [vmem:[%s216_s1 + $0x8] sm:$0xff]   ;;  %153 = vmatprep.mubr.msk.bf16.mxu0 %vm163_vm1, %v162_v0  ;;  %23 = vst.msk [vmem:[#allocation2] sm:$0xff] %vm22_vm0, %v162_v0  ;;  %v160_v2 = vld [vmem:[%s216_s1] sm:$0xff]   ;;  %vm129_vm3 = vcmask 257024   ;;  %vm131_vm4 = vcmask 253952  }
   0x2   :  { %150 = vmatpush3.bf16.msra.mxu0 %v159_v1  ;;  %v161_v3 = vld [vmem:[%s217_s0] sm:$0x1f]   ;;  %25 = vst.msk [vmem:[#allocation2 + $0x8] sm:$0x3] %vm24_vm2, %v162_v0 }
   0x3   :  { %151 = vmatprep.subr.bf16.mxu0 %v162_v0  ;;  %v115_v11 = vld [vmem:[%s218_s3] sm:$0xf]  ;;  %v116_v16 = vld [vmem:[%s218_s3 + $0x4] sm:$0x1] }
   0x4   :  { %v141_v13 = vld [vmem:[%s219_s2] ss:$0 sm:$0xff]  ;;  %v117_v14 = vunpack.c.l.bf16 %v115_v11  ;;  %v118_v19 = vunpack.c.l.bf16 %v116_v16 }
   0x6   :  { %152 = vmatpush3.bf16.msra.mxu0 %v160_v2 }
   0x8   :  { %v28_v4 = vld [vmem:[#allocation2] sm:$0xff] }
   0x9   :  { %154 = vmatmul.mubr.msk.bf16.vlgmr.msra.gmra.mxu0 %vm22_vm0, %v161_v3  ;;  %v29_v8 = vld [vmem:[#allocation2 + $0x8] sm:$0x3] }
  0xc9   :  { %v89_v5 = vpop.f32.mrf.mxu0 }
  0xca   :  { %v96_v6 = vadd.f32 %v89_v5, %v28_v4 }
  0xcb   :  { %v155_v7 = vpop.f32.mrf.mxu0 }
  0xcc   :  { %98 = vst.msk [vmem:[#allocation2] sm:$0xff] %vm22_vm0, %v96_v6 }
  0xcd   :  { %v92_v9 = vpop.f32.mrf.mxu0 }
  0xce   :  { %v97_v10 = vadd.f32 %v92_v9, %v29_v8 }
  0xcf   :  { %v156_v12 = vpop.f32.mrf.mxu0 }
  0xd0   :  { %100 = vst.msk [vmem:[#allocation2 + $0x8] sm:$0x3] %vm24_vm2, %v97_v10 }
  0xd3   :  { %v104_v15 = vld [vmem:[#allocation2] sm:$0xff] }
  0xd4   :  { %v113_v17 = vadd.f32 %v141_v13, %v104_v15 }
  0xd6   :  { %v119_v18 = vadd.f32 %v117_v14, %v113_v17 }
  0xd7   :  { %v105_v20 = vld [vmem:[#allocation2 + $0x8] sm:$0x3] }
  0xd8   :  { %v144_v21 = vpack.c.bf16 %v119_v18, %v119_v18  ;;  %v114_v22 = vadd.f32 %v141_v13, %v105_v20 }
  0xda   :  { %130 = vst.msk [vmem:[%s220_s4] sm:$0xf] %vm129_vm3, %v144_v21  ;;  %v120_v23 = vadd.f32 %v118_v19, %v114_v22 }
  0xdc   :  { %v145_v24 = vpack.c.bf16 %v120_v23, %v120_v23 }
  0xde   :  { %132 = vst.msk [vmem:[%s220_s4 + $0x4] sm:$0x1] %vm131_vm4, %v145_v24 }

// kernel: vit_forward.20
= control target key start
LH: loop header
LB: loop body
LE: loop exit
PB: predicated region body
PF: predicated region fallthrough
CT: control target
= control target key end

     0   :  { %vm37_vm0 = vcmask 261120   ;;  %vm41_vm1 = vcmask 254976   ;;  %v259_v17 = vmov 0.0   ;;  %vm260_vm2 = vmmov 0   ;;  %s323_s0 = inlined_call_operand.vmem [shape: bf16[10,32], index: 0, kind: input, shape index: {}]   ;;  %s324_s1 = inlined_call_operand.vmem [shape: bf16[32,64], index: 1, kind: input, shape index: {}]   ;;  %s325_s2 = inlined_call_operand.vmem [shape: f32[1,32], index: 2, kind: input, shape index: {}]   ;;  %s326_s3 = inlined_call_operand.vmem [shape: f32[1,32], index: 3, kind: input, shape index: {}]   ;;  %s327_s4 = inlined_call_operand.vmem [shape: f32[1,64], index: 4, kind: input, shape index: {}]   ;;  %s328_s5 = inlined_call_operand.vmem [shape: bf16[10,64], index: 5, kind: output, shape index: {}]  }
   0x1   :  { %v33_v0 = vld [vmem:[%s323_s0] sm:$0xf]  ;;  %v34_v1 = vld [vmem:[%s323_s0 + $0x4] sm:$0x1]  ;;  %v248_v16 = vld [vmem:[%s324_s1 + $0x8] sm:$0xff]   ;;  %238 = vmatprep.subr.bf16.mxu0 %v259_v17  ;;  %242 = vmatprep.mubr.msk.bf16.mxu0 %vm260_vm2, %v259_v17  ;;  %vm25_vm3 = vcmask 523264  }
   0x2   :  { %v35_v2 = vunpack.c.l.bf16 %v33_v0  ;;  %v36_v3 = vunpack.c.l.bf16 %v34_v1  ;;  %239 = vmatpush3.bf16.msra.mxu0 %v248_v16  ;;  %v249_v18 = vld [vmem:[%s324_s1] sm:$0xff]   ;;  %26 = vst.msk [vmem:[#allocation2] sm:$0xff] %vm25_vm3, %v259_v17  ;;  %vm92_vm4 = vcmask 257024   ;;  %vm94_vm5 = vcmask 253952  }
   0x3   :  { %240 = vmatprep.subr.bf16.mxu0 %v259_v17  ;;  %v220_v26 = vld [vmem:[%s325_s2] ss:$0 sm:$0xff]  ;;  %vm27_vm6 = vcmask 517120   ;;  %vm212_vm7 = vcmask 519168   ;;  %vm214_vm8 = vcmask 516096  }
   0x4   :  { %v38_v4 = vsel %vm37_vm0, %v35_v2, 0.0  ;;  %v42_v5 = vsel %vm41_vm1, %v36_v3, 0.0  ;;  %v221_v28 = vld [vmem:[%s326_s3] ss:$0 sm:$0xff]  ;;  %28 = vst.msk [vmem:[#allocation2 + $0x8] sm:$0x3] %vm27_vm6, %v259_v17 }
   0x5   :  { %39 = vadd.xlane.f32.xlu0 %v38_v4  ;;  %v228_v46 = vld [vmem:[%s327_s4] ss:$0 sm:$0xff] }
   0x6   :  { %241 = vmatpush3.bf16.msra.mxu0 %v249_v18 }
   0x9   :  { %43 = vadd.xlane.f32.xlu0 %v42_v5  ;;  %v98_v38 = vld [vmem:[#allocation2] sm:$0xff] }
   0xb   :  { %v99_v42 = vld [vmem:[#allocation2 + $0x8] sm:$0x3] }
  0x8e   :  { %v40_v6 = vpop.xlane.xlu0 %39 }
  0x8f   :  { %v46_v7 = vmul.f32 0.03125, %v40_v6 }
  0x91   :  { %v48_v8 = vsub.f32 %v35_v2, %v46_v7 }
  0x92   :  { %v44_v9 = vpop.xlane.xlu0 %43 }
  0x93   :  { %v47_v10 = vmul.f32 0.03125, %v44_v9  ;;  %v50_v11 = vmul.f32 %v48_v8, %v48_v8 }
  0x95   :  { %v49_v12 = vsub.f32 %v36_v3, %v47_v10  ;;  %v52_v13 = vsel %vm37_vm0, %v50_v11, 0.0 }
  0x96   :  { %53 = vadd.xlane.f32.xlu1 %v52_v13 }
  0x97   :  { %v51_v14 = vmul.f32 %v49_v12, %v49_v12 }
  0x99   :  { %v55_v15 = vsel %vm41_vm1, %v51_v14, 0.0 }
  0x9a   :  { %56 = vadd.xlane.f32.xlu1 %v55_v15 }
 0x11f   :  { %v54_v19 = vpop.xlane.xlu1 %53 }
 0x120   :  { %v58_v20 = vmul.f32 0.03125, %v54_v19 }
 0x122   :  { %v60_v21 = vadd.f32 1e-05, %v58_v20 }
 0x123   :  { %v57_v22 = vpop.xlane.xlu1 %56 }
 0x124   :  { %251 = vrsqrt.f32 %v60_v21  ;;  %v59_v23 = vmul.f32 0.03125, %v57_v22 }
 0x126   :  { %v61_v24 = vadd.f32 1e-05, %v59_v23 }
 0x128   :  { %253 = vrsqrt.f32 %v61_v24 }
 0x131   :  { %v252_v25 = vpop.eup %251 }
 0x132   :  { %v64_v27 = vmul.f32 %v252_v25, %v48_v8 }
 0x134   :  { %v73_v29 = vmul.f32 %v220_v26, %v64_v27 }
 0x135   :  { %v254_v30 = vpop.eup %253 }
 0x136   :  { %v82_v31 = vadd.f32 %v221_v28, %v73_v29  ;;  %v65_v32 = vmul.f32 %v254_v30, %v49_v12 }
 0x138   :  { %v231_v33 = vpack.c.bf16 %v82_v31, %v82_v31  ;;  %v74_v34 = vmul.f32 %v220_v26, %v65_v32 }
 0x13a   :  { %93 = vst.msk [vmem:[#allocation3] sm:$0xf] %vm92_vm4, %v231_v33  ;;  %v83_v35 = vadd.f32 %v221_v28, %v74_v34 }
 0x13c   :  { %v232_v36 = vpack.c.bf16 %v83_v35, %v83_v35 }
 0x13e   :  { %95 = vst.msk [vmem:[#allocation3 + $0x4] sm:$0x1] %vm94_vm5, %v232_v36 }
 0x145   :  { %v250_v37 = vld [vmem:[#allocation3] sm:$0x1f]  }
 0x146   :  { %243 = vmatmul.mubr.msk.bf16.vlgmr.msra.gmra.mxu0 %vm37_vm0, %v250_v37 }
 0x206   :  { %v159_v39 = vpop.f32.mrf.mxu0 }
 0x207   :  { %v166_v40 = vadd.f32 %v159_v39, %v98_v38 }
 0x208   :  { %v244_v41 = vpop.f32.mrf.mxu0 }
 0x209   :  { %169 = vst.msk [vmem:[#allocation2] sm:$0xff] %vm25_vm3, %v166_v40 }
 0x20a   :  { %v162_v43 = vpop.f32.mrf.mxu0 }
 0x20b   :  { %v167_v44 = vadd.f32 %v162_v43, %v99_v42 }
 0x20c   :  { %v245_v45 = vpop.f32.mrf.mxu0 }
 0x20d   :  { %171 = vst.msk [vmem:[#allocation2 + $0x8] sm:$0x3] %vm27_vm6, %v167_v44 }
 0x210   :  { %v175_v47 = vld [vmem:[#allocation2] sm:$0xff] }
 0x211   :  { %v184_v48 = vadd.f32 %v228_v46, %v175_v47 }
 0x213   :  { %v188_v49 = vmul.f32 %v184_v48, %v184_v48  ;;  %v186_v62 = vmul.f32 0.5, %v184_v48 }
 0x214   :  { %v176_v50 = vld [vmem:[#allocation2 + $0x8] sm:$0x3] }
 0x215   :  { %v190_v51 = vmul.f32 %v188_v49, %v184_v48  ;;  %v185_v52 = vadd.f32 %v228_v46, %v176_v50 }
 0x217   :  { %v192_v53 = vmul.f32 0.044715, %v190_v51  ;;  %v189_v54 = vmul.f32 %v185_v52, %v185_v52  ;;  %v187_v3 = vmul.f32 0.5, %v185_v52 }
 0x219   :  { %v194_v55 = vadd.f32 %v192_v53, %v184_v48  ;;  %v191_v56 = vmul.f32 %v189_v54, %v185_v52 }
 0x21b   :  { %v196_v57 = vmul.f32 0.7978846, %v194_v55  ;;  %v193_v58 = vmul.f32 0.044715, %v191_v56 }
 0x21d   :  { %255 = vtanh.f32 %v196_v57  ;;  %v195_v59 = vadd.f32 %v193_v58, %v185_v52 }
 0x21f   :  { %v197_v60 = vmul.f32 0.7978846, %v195_v59 }
 0x221   :  { %257 = vtanh.f32 %v197_v60 }
 0x22a   :  { %v256_v61 = vpop.eup %255 }
 0x22b   :  { %v200_v63 = vadd.f32 1.0, %v256_v61 }
 0x22d   :  { %v202_v0 = vmul.f32 %v200_v63, %v186_v62 }
 0x22e   :  { %v258_v1 = vpop.eup %257 }
 0x22f   :  { %v233_v2 = vpack.c.bf16 %v202_v0, %v202_v0  ;;  %v201_v4 = vadd.f32 1.0, %v258_v1 }
 0x231   :  { %213 = vst.msk [vmem:[%s328_s5] sm:$0xf] %vm212_vm7, %v233_v2  ;;  %v203_v5 = vmul.f32 %v201_v4, %v187_v3 }
 0x233   :  { %v234_v6 = vpack.c.bf16 %v203_v5, %v203_v5 }
 0x235   :  { %215 = vst.msk [vmem:[%s328_s5 + $0x4] sm:$0x1] %vm214_vm8, %v234_v6 }

// kernel: vit_forward.21
= control target key start
LH: loop header
LB: loop body
LE: loop exit
PB: predicated region body
PF: predicated region fallthrough
CT: control target
= control target key end

     0   :  { %vm22_vm0 = vcmask 261120   ;;  %v189_v0 = vmov 0.0   ;;  %vm190_vm1 = vmmov 0   ;;  %vm67_vm2 = vcmask 523264   ;;  %s248_s1 = inlined_call_operand.vmem [shape: bf16[64,32], index: 1, kind: input, shape index: {}]   ;;  %s249_s0 = inlined_call_operand.vmem [shape: bf16[10,64], index: 0, kind: input, shape index: {}]   ;;  %s250_s3 = inlined_call_operand.vmem [shape: bf16[10,32], index: 3, kind: input, shape index: {}]   ;;  %s251_s2 = inlined_call_operand.vmem [shape: f32[1,32], index: 2, kind: input, shape index: {}]   ;;  %s252_s4 = inlined_call_operand.vmem [shape: bf16[10,32], index: 4, kind: output, shape index: {}]  }
   0x1   :  { %170 = vmatprep.subr.bf16.mxu0 %v189_v0  ;;  %v184_v1 = vld [vmem:[%s248_s1 + $0x18] sm:$0xff]   ;;  %178 = vmatprep.mubr.msk.bf16.mxu0 %vm190_vm1, %v189_v0  ;;  %23 = vst.msk [vmem:[#allocation2] sm:$0xff] %vm22_vm0, %v189_v0  ;;  %v185_v2 = vld [vmem:[%s248_s1 + $0x10] sm:$0xff]   ;;  %v186_v3 = vld [vmem:[%s248_s1 + $0x8] sm:$0xff]   ;;  %vm24_vm3 = vcmask 254976   ;;  %vm146_vm4 = vcmask 257024  }
   0x2   :  { %171 = vmatpush3.bf16.msra.mxu0 %v184_v1  ;;  %v187_v4 = vld [vmem:[%s248_s1] sm:$0xff]   ;;  %25 = vst.msk [vmem:[#allocation2 + $0x8] sm:$0x3] %vm24_vm3, %v189_v0  ;;  %vm148_vm5 = vcmask 253952  }
   0x3   :  { %172 = vmatprep.subr.bf16.mxu0 %v189_v0  ;;  %v188_v5 = vld [vmem:[%s249_s0] sm:$0x1f]  }
   0x4   :  { %v132_v13 = vld [vmem:[%s250_s3] sm:$0xf]  ;;  %v133_v18 = vld [vmem:[%s250_s3 + $0x4] sm:$0x1] }
   0x5   :  { %v160_v15 = vld [vmem:[%s251_s2] ss:$0 sm:$0xff]  ;;  %v134_v16 = vunpack.c.l.bf16 %v132_v13  ;;  %v135_v21 = vunpack.c.l.bf16 %v133_v18 }
   0x6   :  { %173 = vmatpush3.bf16.msra.mxu0 %v185_v2 }
   0x7   :  { %174 = vmatprep.subr.bf16.mxu0 %v189_v0 }
   0x8   :  { %v28_v6 = vld [vmem:[#allocation2] sm:$0xff] }
   0x9   :  { %v29_v10 = vld [vmem:[#allocation2 + $0x8] sm:$0x3] }
   0xa   :  { %175 = vmatpush3.bf16.msra.mxu0 %v186_v3 }
   0xb   :  { %176 = vmatprep.subr.bf16.mxu0 %v189_v0 }
   0xe   :  { %177 = vmatpush3.bf16.msra.mxu0 %v187_v4 }
  0x11   :  { %179 = vmatmul.mubr.msk.bf16.vlgmr.msra.gmra.mxu0 %vm67_vm2, %v188_v5 }
  0xd1   :  { %v105_v7 = vpop.f32.mrf.mxu0 }
  0xd2   :  { %v112_v8 = vadd.f32 %v105_v7, %v28_v6 }
  0xd3   :  { %v180_v9 = vpop.f32.mrf.mxu0 }
  0xd4   :  { %115 = vst.msk [vmem:[#allocation2] sm:$0xff] %vm22_vm0, %v112_v8 }
  0xd5   :  { %v108_v11 = vpop.f32.mrf.mxu0 }
  0xd6   :  { %v113_v12 = vadd.f32 %v108_v11, %v29_v10 }
  0xd7   :  { %v181_v14 = vpop.f32.mrf.mxu0 }
  0xd8   :  { %117 = vst.msk [vmem:[#allocation2 + $0x8] sm:$0x3] %vm24_vm3, %v113_v12 }
  0xdb   :  { %v121_v17 = vld [vmem:[#allocation2] sm:$0xff] }
  0xdc   :  { %v130_v19 = vadd.f32 %v160_v15, %v121_v17 }
  0xde   :  { %v136_v20 = vadd.f32 %v134_v16, %v130_v19 }
  0xdf   :  { %v122_v22 = vld [vmem:[#allocation2 + $0x8] sm:$0x3] }
  0xe0   :  { %v163_v23 = vpack.c.bf16 %v136_v20, %v136_v20  ;;  %v131_v24 = vadd.f32 %v160_v15, %v122_v22 }
  0xe2   :  { %147 = vst.msk [vmem:[%s252_s4] sm:$0xf] %vm146_vm4, %v163_v23  ;;  %v137_v25 = vadd.f32 %v135_v21, %v131_v24 }
  0xe4   :  { %v164_v26 = vpack.c.bf16 %v137_v25, %v137_v25 }
  0xe6   :  { %149 = vst.msk [vmem:[%s252_s4 + $0x4] sm:$0x1] %vm148_vm5, %v164_v26 }

// kernel: vit_forward.27
= control target key start
LH: loop header
LB: loop body
LE: loop exit
PB: predicated region body
PF: predicated region fallthrough
CT: control target
= control target key end

     0   :  { %vm18_vm0 = vcmask 261120   ;;  %vm22_vm1 = vcmask 254976   ;;  %s121_s0 = inlined_call_operand.vmem [shape: bf16[10,32], index: 0, kind: input, shape index: {}]   ;;  %s122_s1 = inlined_call_operand.vmem [shape: f32[1,32], index: 1, kind: input, shape index: {}]   ;;  %s123_s2 = inlined_call_operand.vmem [shape: f32[1,32], index: 2, kind: input, shape index: {}]   ;;  %s124_s3 = inlined_call_operand.vmem [shape: f32[10,32], index: 3, kind: output, shape index: {}]  }
   0x1   :  { %v14_v0 = vld [vmem:[%s121_s0] sm:$0xf]  ;;  %v15_v1 = vld [vmem:[%s121_s0 + $0x4] sm:$0x1] }
   0x2   :  { %v16_v2 = vunpack.c.l.bf16 %v14_v0  ;;  %v17_v3 = vunpack.c.l.bf16 %v15_v1  ;;  %v71_v23 = vld [vmem:[%s122_s1] ss:$0 sm:$0xff] }
   0x3   :  { %v72_v25 = vld [vmem:[%s123_s2] ss:$0 sm:$0xff] }
   0x4   :  { %v19_v4 = vsel %vm18_vm0, %v16_v2, 0.0  ;;  %v23_v5 = vsel %vm22_vm1, %v17_v3, 0.0 }
   0x5   :  { %20 = vadd.xlane.f32.xlu0 %v19_v4 }
   0x9   :  { %24 = vadd.xlane.f32.xlu0 %v23_v5 }
  0x8e   :  { %v21_v6 = vpop.xlane.xlu0 %20 }
  0x8f   :  { %v27_v7 = vmul.f32 0.03125, %v21_v6 }
  0x91   :  { %v29_v8 = vsub.f32 %v16_v2, %v27_v7 }
  0x92   :  { %v25_v9 = vpop.xlane.xlu0 %24 }
  0x93   :  { %v28_v10 = vmul.f32 0.03125, %v25_v9  ;;  %v31_v11 = vmul.f32 %v29_v8, %v29_v8 }
  0x95   :  { %v30_v12 = vsub.f32 %v17_v3, %v28_v10  ;;  %v33_v13 = vsel %vm18_vm0, %v31_v11, 0.0 }
  0x96   :  { %34 = vadd.xlane.f32.xlu1 %v33_v13 }
  0x97   :  { %v32_v14 = vmul.f32 %v30_v12, %v30_v12 }
  0x99   :  { %v36_v15 = vsel %vm22_vm1, %v32_v14, 0.0 }
  0x9a   :  { %37 = vadd.xlane.f32.xlu1 %v36_v15 }
 0x11f   :  { %v35_v16 = vpop.xlane.xlu1 %34 }
 0x120   :  { %v39_v17 = vmul.f32 0.03125, %v35_v16 }
 0x122   :  { %v41_v18 = vadd.f32 1e-05, %v39_v17 }
 0x123   :  { %v38_v19 = vpop.xlane.xlu1 %37 }
 0x124   :  { %73 = vrsqrt.f32 %v41_v18  ;;  %v40_v20 = vmul.f32 0.03125, %v38_v19 }
 0x126   :  { %v42_v21 = vadd.f32 1e-05, %v40_v20 }
 0x128   :  { %75 = vrsqrt.f32 %v42_v21 }
 0x131   :  { %v74_v22 = vpop.eup %73 }
 0x132   :  { %v45_v24 = vmul.f32 %v74_v22, %v29_v8 }
 0x134   :  { %v54_v26 = vmul.f32 %v71_v23, %v45_v24 }
 0x135   :  { %v76_v27 = vpop.eup %75 }
 0x136   :  { %v63_v28 = vadd.f32 %v72_v25, %v54_v26  ;;  %v46_v29 = vmul.f32 %v76_v27, %v30_v12 }
 0x138   :  { %65 = vst.msk [vmem:[%s124_s3] sm:$0xff] %vm18_vm0, %v63_v28  ;;  %v55_v30 = vmul.f32 %v71_v23, %v46_v29 }
 0x13a   :  { %v64_v31 = vadd.f32 %v72_v25, %v55_v30 }
 0x13c   :  { %66 = vst.msk [vmem:[%s124_s3 + $0x8] sm:$0x3] %vm22_vm1, %v64_v31 }

</bundles_post_ra>
